<compile_context>
chip_gen: v6e
topology: v6e:2x2x1
jax: 0.10.0
libtpu: 0.0.40
codegen_flags: <defaults>
</compile_context>

<pallas_src>
import functools

import jax
import jax.numpy as jnp
import numpy as np
from jax.experimental import pallas as pl
from jax.experimental.pallas import tpu as pltpu

KERNEL_SIZES = (2, 3, 4, 5, 6)
PADDINGS = (0, 0, 1, 2, 3)
N_FILTERS = 16
PAD = max(PADDINGS)                       # 3: shared left pad for all convs
KMAX = max(KERNEL_SIZES)                  # 6: unified window width
OUT_DIM = N_FILTERS * len(KERNEL_SIZES)   # 80
OUT_PAD = 128                             # lane-dense padded output width
NEG = -1e30                               # mask value for invalid window positions


def _cnn_embed_kernel(cidx_ref, w_ref, mask_ref, bias_ref, o_ref, *, TB, T, C):
    """One block of TB words per grid step.

    cidx_ref : (TB, T*KMAX) int32  combined (tap, char) indices: column t*KMAX+j
                                   holds j*V + char_index at padded position t+j,
                                   or -1 for pad / unk (matches no lane).
    w_ref    : (C, 128)  bf16      folded conv weights, C = KMAX*V (resident)
    mask_ref : (T, 128)  f32       0 for valid window positions, -1e30 otherwise
    bias_ref : (1, 128)  f32       per-filter biases (cols 80..127 zero)
    o_ref    : (TB, 128) f32       per-word maxima, lane-dense (cols 80..127 unused)
    """
    cidx = cidx_ref[...]                                         # (TB, T*KMAX) int32
    w = w_ref[...]                                               # (C, 128) bf16
    iota_c = jax.lax.broadcasted_iota(jnp.int32, (TB, C), 1)

    result = jnp.full((TB, OUT_PAD), NEG, dtype=jnp.float32)
    for t in range(T):                                           # static unroll, T = L + 2
        base = t * KMAX
        # One-hot im2col row of window t, built in-register: lane j*V+v is set iff
        # the padded char at position t+j equals v.  No copies, no relayouts.
        hit = cidx[:, base:base + 1] == iota_c
        for j in range(1, KMAX):
            hit = hit | (cidx[:, base + j:base + j + 1] == iota_c)
        # All 5 convs x all 16 filters for window t: one bf16 MXU matmul, f32 acc.
        s = jnp.dot(hit.astype(w.dtype), w,
                    preferred_element_type=jnp.float32)          # (TB, 128)
        # Mask convs for which window t is out of range, fold into the running max.
        result = jnp.maximum(result, s + mask_ref[t:t + 1, :])
    # Bias after the max (commutes with it), lane-dense store.
    o_ref[...] = result + bias_ref[...]


def _pack_folded_weights(emb_table, conv_weights, param_dtype):
    """W_fold[j*V + v, ci*16 + f] = sum_e emb[v,e] * w_ci[f,e,j]; taps j >= k_ci zero."""
    V, _ = emb_table.shape
    emb32 = emb_table.astype(jnp.float32)
    w_fold = jnp.zeros((KMAX * V, OUT_PAD), jnp.float32)
    for ci, (k, w) in enumerate(zip(KERNEL_SIZES, conv_weights)):
        f = jnp.einsum("ve,fej->jvf", emb32, w.astype(jnp.float32))   # (k, V, 16)
        w_fold = w_fold.at[:k * V, ci * N_FILTERS:(ci + 1) * N_FILTERS].set(
            f.reshape(k * V, N_FILTERS))
    return w_fold.astype(param_dtype)


def _window_mask(L, T):
    """Window t is valid for conv (k, p) iff PAD - p <= t <= L + PAD + p - k."""
    mask = np.zeros((T, OUT_PAD), np.float32)
    for ci, (k, p) in enumerate(zip(KERNEL_SIZES, PADDINGS)):
        lo, hi = PAD - p, L + PAD + p - k
        mask[:lo, ci * N_FILTERS:(ci + 1) * N_FILTERS] = NEG
        mask[hi + 1:, ci * N_FILTERS:(ci + 1) * N_FILTERS] = NEG
    return jnp.asarray(mask)


def _choose_block(B, block_b):
    TB = min(block_b, B)
    if TB == B and B >= 256:
        TB = -(-B // 2)          # keep >= 2 grid steps: v7x has 2 TensorCores
    if TB < B:
        TB = -(-TB // 8) * 8     # sublane-align the block when the grid has > 1 step
    return TB


def cnn_embedding_forward(word, emb_table, conv_weights, conv_biases, *,
                          block_b=512, param_dtype=jnp.bfloat16):
    """word: (B, L) int32 (negatives = unk).  Returns (B, 80) float32.

    block_b: words per grid step.  Per-step VMEM use is tiny (< ~2 MB even at
    TB=512 — only int32 indices, a (TB, KMAX*V) bf16 one-hot row and a (TB, 128)
    f32 accumulator), so 512 is safe on v5e/v6e/v7x alike.
    param_dtype: folded-weight / MXU operand dtype (bf16 recommended; f32 accum).
    """
    B, L = word.shape
    V, E = emb_table.shape
    assert min(L + 2 * p - k for k, p in zip(KERNEL_SIZES, PADDINGS)) >= 0, (
        "word too short for the largest conv (same constraint as the torch module)")

    T = 1 + max(L + PAD + p - k for k, p in zip(KERNEL_SIZES, PADDINGS))   # = L + 2
    C = KMAX * V
    rpad = T - 1 + KMAX - (L + PAD)

    TB = _choose_block(B, block_b)
    B_pad = -(-B // TB) * TB

    # ---- index-level padding + windowing (tiny, wrapper-side XLA work) ----
    idxp = jnp.pad(word.astype(jnp.int32), ((0, B_pad - B), (PAD, rpad)),
                   constant_values=-1)                                     # (B_pad, L+PAD+rpad)
    tj = np.arange(T)[:, None] + np.arange(KMAX)[None, :]                  # (T, KMAX)
    widx = idxp[:, tj]                                                     # (B_pad, T, KMAX)
    offs = np.arange(KMAX, dtype=np.int32) * V
    cidx = jnp.where(widx >= 0, widx + offs, -1)                           # -1 never matches
    cidx = cidx.reshape(B_pad, T * KMAX).astype(jnp.int32)

    # ---- parameters (tiny, packed once) ----
    w_fold = _pack_folded_weights(emb_table, conv_weights, param_dtype)    # (C, 128)
    mask = _window_mask(L, T)                                              # (T, 128)
    bias_vec = jnp.zeros((1, OUT_PAD), jnp.float32)
    for ci, b in enumerate(conv_biases):
        bias_vec = bias_vec.at[0, ci * N_FILTERS:(ci + 1) * N_FILTERS].set(
            b.astype(jnp.float32))

    kernel = functools.partial(_cnn_embed_kernel, TB=TB, T=T, C=C)
    out = pl.pallas_call(
        kernel,
        out_shape=jax.ShapeDtypeStruct((B_pad, OUT_PAD), jnp.float32),
        grid_spec=pltpu.PrefetchScalarGridSpec(
            num_scalar_prefetch=0,
            grid=(B_pad // TB,),
            in_specs=[
                pl.BlockSpec((TB, T * KMAX), lambda b: (b, 0)),   # windowed indices
                pl.BlockSpec((C, OUT_PAD), lambda b: (0, 0)),     # folded conv weights
                pl.BlockSpec((T, OUT_PAD), lambda b: (0, 0)),     # window validity mask
                pl.BlockSpec((1, OUT_PAD), lambda b: (0, 0)),     # biases
            ],
            out_specs=pl.BlockSpec((TB, OUT_PAD), lambda b: (b, 0)),
        ),
        compiler_params=pltpu.CompilerParams(
            dimension_semantics=("parallel",),
            vmem_limit_bytes=32 * 1024 * 1024),
    )(cidx, w_fold, mask, bias_vec)

    return out[:B, :OUT_DIM]


def _reference(word, emb_table, conv_weights, conv_biases, param_dtype=jnp.bfloat16):
    """Pure-JAX reference reproducing the torch forward as a one-hot Conv1d that uses
    the SAME folded bf16 weights as the kernel (bit-identical quantization); the
    compute path itself is stock lax.conv + bias + max."""
    V, _ = emb_table.shape
    w_fold = _pack_folded_weights(emb_table, conv_weights, param_dtype).astype(jnp.float32)
    outs = []
    for ci, (k, p, b) in enumerate(zip(KERNEL_SIZES, PADDINGS, conv_biases)):
        wf = w_fold[:k * V, ci * N_FILTERS:(ci + 1) * N_FILTERS].reshape(k, V, N_FILTERS)
        wf = jnp.transpose(wf, (2, 1, 0))                       # (16, V, k) "OIH"
        idx = jnp.pad(word, ((0, 0), (p, p)), constant_values=-1)
        oh = (idx[:, None, :] == jnp.arange(V)[None, :, None]).astype(jnp.float32)
        y = jax.lax.conv_general_dilated(oh, wf, (1,), "VALID",
                                         dimension_numbers=("NCH", "OIH", "NCH"))
        y = y + b.astype(jnp.float32)[None, :, None]
        outs.append(jnp.max(y, axis=-1))
    return jnp.concatenate(outs, axis=-1)


if __name__ == "__main__":
    emb_size = 32     # E
    voc_size = 20     # V (char-level vocabulary)
    B, L = 2, 8       # (batch of words, chars per word)

    key = jax.random.PRNGKey(0)
    k_emb, k_word, *k_w = jax.random.split(key, 2 + 2 * len(KERNEL_SIZES))

    emb_table = jax.random.normal(k_emb, (voc_size, emb_size), dtype=jnp.float32)

    conv_weights, conv_biases = [], []
    for i, k in enumerate(KERNEL_SIZES):
        fan_in = emb_size * k
        bound = 1.0 / np.sqrt(fan_in)
        conv_weights.append(jax.random.uniform(
            k_w[2 * i], (N_FILTERS, emb_size, k), jnp.float32, -bound, bound))
        conv_biases.append(jax.random.uniform(
            k_w[2 * i + 1], (N_FILTERS,), jnp.float32, -bound, bound))

    # word indices in [-2, voc_size): negatives exercise the unk-masking path
    word = jax.random.randint(k_word, (B, L), -2, voc_size, dtype=jnp.int32)

    out = cnn_embedding_forward(word, emb_table, conv_weights, conv_biases)
    out = jax.block_until_ready(out)
    ref = _reference(word, emb_table, conv_weights, conv_biases)
    np.testing.assert_allclose(np.asarray(out), np.asarray(ref), rtol=1e-3, atol=1e-3)
    assert out.shape == (B, OUT_DIM)

    # Second small config exercising a multi-step grid + batch padding (TB < B).
    word2 = jax.random.randint(jax.random.PRNGKey(1), (40, L), -2, voc_size, jnp.int32)
    out2 = jax.block_until_ready(cnn_embedding_forward(
        word2, emb_table, conv_weights, conv_biases, block_b=16))
    ref2 = _reference(word2, emb_table, conv_weights, conv_biases)
    np.testing.assert_allclose(np.asarray(out2), np.asarray(ref2), rtol=1e-3, atol=1e-3)

    print("KERNEL_OK")
</pallas_src>

<mosaic_0001>
module attributes {stable_mosaic.version = 11 : i64} {
  func.func @_cnn_embed_kernel(%arg0: i32, %arg1: memref<2x60xi32, #tpu.memory_space<vmem>>, %arg2: memref<120x128xbf16, #tpu.memory_space<vmem>>, %arg3: memref<10x128xf32, #tpu.memory_space<vmem>>, %arg4: memref<1x128xf32, #tpu.memory_space<vmem>>, %arg5: memref<2x128xf32, #tpu.memory_space<vmem>>) attributes {dimension_semantics = [#tpu.dimension_semantics<parallel>], iteration_bounds = array<i64: 1>, scalar_prefetch = 0 : i64, scratch_operands = 0 : i64, tpu.core_type = #tpu.core_type<tc>, window_params = [{transform_indices = @transform_0, window_bounds = array<i64: 2, 60>}, {pipeline_mode = #tpu.pipeline_mode<synchronous>, transform_indices = @transform_1, window_bounds = array<i64: 120, 128>}, {pipeline_mode = #tpu.pipeline_mode<synchronous>, transform_indices = @transform_2, window_bounds = array<i64: 10, 128>}, {pipeline_mode = #tpu.pipeline_mode<synchronous>, transform_indices = @transform_3, window_bounds = array<i64: 1, 128>}, {transform_indices = @transform_4, window_bounds = array<i64: 2, 128>}]} {
    %c0 = arith.constant 0 : index
    %c0_0 = arith.constant 0 : index
    %0 = vector.load %arg1[%c0, %c0_0] : memref<2x60xi32, #tpu.memory_space<vmem>>, vector<2x60xi32>
    %c0_1 = arith.constant 0 : index
    %c0_2 = arith.constant 0 : index
    %1 = vector.load %arg2[%c0_1, %c0_2] : memref<120x128xbf16, #tpu.memory_space<vmem>>, vector<120x128xbf16>
    %2 = tpu.iota {dimensions = array<i32: 1>} : vector<2x120xi32>
    %cst = arith.constant -1.000000e+30 : f32
    %3 = vector.broadcast %cst : f32 to vector<2x128xf32>
    %4 = vector.extract_strided_slice %0 {offsets = [0, 0], sizes = [2, 1], strides = [1, 1]} : vector<2x60xi32> to vector<2x1xi32>
    %5 = vector.broadcast %4 : vector<2x1xi32> to vector<2x120xi32>
    %6 = arith.cmpi eq, %5, %2 : vector<2x120xi32>
    %7 = vector.extract_strided_slice %0 {offsets = [0, 1], sizes = [2, 1], strides = [1, 1]} : vector<2x60xi32> to vector<2x1xi32>
    %8 = vector.broadcast %7 : vector<2x1xi32> to vector<2x120xi32>
    %9 = arith.cmpi eq, %8, %2 : vector<2x120xi32>
    %10 = arith.ori %6, %9 : vector<2x120xi1>
    %11 = vector.extract_strided_slice %0 {offsets = [0, 2], sizes = [2, 1], strides = [1, 1]} : vector<2x60xi32> to vector<2x1xi32>
    %12 = vector.broadcast %11 : vector<2x1xi32> to vector<2x120xi32>
    %13 = arith.cmpi eq, %12, %2 : vector<2x120xi32>
    %14 = arith.ori %10, %13 : vector<2x120xi1>
    %15 = vector.extract_strided_slice %0 {offsets = [0, 3], sizes = [2, 1], strides = [1, 1]} : vector<2x60xi32> to vector<2x1xi32>
    %16 = vector.broadcast %15 : vector<2x1xi32> to vector<2x120xi32>
    %17 = arith.cmpi eq, %16, %2 : vector<2x120xi32>
    %18 = arith.ori %14, %17 : vector<2x120xi1>
    %19 = vector.extract_strided_slice %0 {offsets = [0, 4], sizes = [2, 1], strides = [1, 1]} : vector<2x60xi32> to vector<2x1xi32>
    %20 = vector.broadcast %19 : vector<2x1xi32> to vector<2x120xi32>
    %21 = arith.cmpi eq, %20, %2 : vector<2x120xi32>
    %22 = arith.ori %18, %21 : vector<2x120xi1>
    %23 = vector.extract_strided_slice %0 {offsets = [0, 5], sizes = [2, 1], strides = [1, 1]} : vector<2x60xi32> to vector<2x1xi32>
    %24 = vector.broadcast %23 : vector<2x1xi32> to vector<2x120xi32>
    %25 = arith.cmpi eq, %24, %2 : vector<2x120xi32>
    %26 = arith.ori %22, %25 : vector<2x120xi1>
    %27 = arith.extui %26 : vector<2x120xi1> to vector<2x120xi32>
    %28 = arith.sitofp %27 : vector<2x120xi32> to vector<2x120xf32>
    %29 = arith.truncf %28 : vector<2x120xf32> to vector<2x120xbf16>
    %cst_3 = arith.constant dense<0.000000e+00> : vector<2x128xf32>
    %30 = tpu.matmul %29, %1, %cst_3 {dimension_numbers = #tpu.dot_dimension_numbers<[1], [0], [0], [1], [0, 0, 1, 1], [], []>} : vector<2x120xbf16>, vector<120x128xbf16>, vector<2x128xf32> -> vector<2x128xf32>
    %c0_4 = arith.constant 0 : index
    %c0_5 = arith.constant 0 : index
    %31 = vector.load %arg3[%c0_4, %c0_5] : memref<10x128xf32, #tpu.memory_space<vmem>>, vector<1x128xf32>
    %32 = vector.broadcast %31 : vector<1x128xf32> to vector<2x128xf32>
    %33 = arith.addf %30, %32 : vector<2x128xf32>
    %34 = arith.maximumf %3, %33 : vector<2x128xf32>
    %35 = vector.extract_strided_slice %0 {offsets = [0, 6], sizes = [2, 1], strides = [1, 1]} : vector<2x60xi32> to vector<2x1xi32>
    %36 = vector.broadcast %35 : vector<2x1xi32> to vector<2x120xi32>
    %37 = arith.cmpi eq, %36, %2 : vector<2x120xi32>
    %38 = vector.extract_strided_slice %0 {offsets = [0, 7], sizes = [2, 1], strides = [1, 1]} : vector<2x60xi32> to vector<2x1xi32>
    %39 = vector.broadcast %38 : vector<2x1xi32> to vector<2x120xi32>
    %40 = arith.cmpi eq, %39, %2 : vector<2x120xi32>
    %41 = arith.ori %37, %40 : vector<2x120xi1>
    %42 = vector.extract_strided_slice %0 {offsets = [0, 8], sizes = [2, 1], strides = [1, 1]} : vector<2x60xi32> to vector<2x1xi32>
    %43 = vector.broadcast %42 : vector<2x1xi32> to vector<2x120xi32>
    %44 = arith.cmpi eq, %43, %2 : vector<2x120xi32>
    %45 = arith.ori %41, %44 : vector<2x120xi1>
    %46 = vector.extract_strided_slice %0 {offsets = [0, 9], sizes = [2, 1], strides = [1, 1]} : vector<2x60xi32> to vector<2x1xi32>
    %47 = vector.broadcast %46 : vector<2x1xi32> to vector<2x120xi32>
    %48 = arith.cmpi eq, %47, %2 : vector<2x120xi32>
    %49 = arith.ori %45, %48 : vector<2x120xi1>
    %50 = vector.extract_strided_slice %0 {offsets = [0, 10], sizes = [2, 1], strides = [1, 1]} : vector<2x60xi32> to vector<2x1xi32>
    %51 = vector.broadcast %50 : vector<2x1xi32> to vector<2x120xi32>
    %52 = arith.cmpi eq, %51, %2 : vector<2x120xi32>
    %53 = arith.ori %49, %52 : vector<2x120xi1>
    %54 = vector.extract_strided_slice %0 {offsets = [0, 11], sizes = [2, 1], strides = [1, 1]} : vector<2x60xi32> to vector<2x1xi32>
    %55 = vector.broadcast %54 : vector<2x1xi32> to vector<2x120xi32>
    %56 = arith.cmpi eq, %55, %2 : vector<2x120xi32>
    %57 = arith.ori %53, %56 : vector<2x120xi1>
    %58 = arith.extui %57 : vector<2x120xi1> to vector<2x120xi32>
    %59 = arith.sitofp %58 : vector<2x120xi32> to vector<2x120xf32>
    %60 = arith.truncf %59 : vector<2x120xf32> to vector<2x120xbf16>
    %cst_6 = arith.constant dense<0.000000e+00> : vector<2x128xf32>
    %61 = tpu.matmul %60, %1, %cst_6 {dimension_numbers = #tpu.dot_dimension_numbers<[1], [0], [0], [1], [0, 0, 1, 1], [], []>} : vector<2x120xbf16>, vector<120x128xbf16>, vector<2x128xf32> -> vector<2x128xf32>
    %c1 = arith.constant 1 : index
    %c0_7 = arith.constant 0 : index
    %62 = vector.load %arg3[%c1, %c0_7] : memref<10x128xf32, #tpu.memory_space<vmem>>, vector<1x128xf32>
    %63 = vector.broadcast %62 : vector<1x128xf32> to vector<2x128xf32>
    %64 = arith.addf %61, %63 : vector<2x128xf32>
    %65 = arith.maximumf %34, %64 : vector<2x128xf32>
    %66 = vector.extract_strided_slice %0 {offsets = [0, 12], sizes = [2, 1], strides = [1, 1]} : vector<2x60xi32> to vector<2x1xi32>
    %67 = vector.broadcast %66 : vector<2x1xi32> to vector<2x120xi32>
    %68 = arith.cmpi eq, %67, %2 : vector<2x120xi32>
    %69 = vector.extract_strided_slice %0 {offsets = [0, 13], sizes = [2, 1], strides = [1, 1]} : vector<2x60xi32> to vector<2x1xi32>
    %70 = vector.broadcast %69 : vector<2x1xi32> to vector<2x120xi32>
    %71 = arith.cmpi eq, %70, %2 : vector<2x120xi32>
    %72 = arith.ori %68, %71 : vector<2x120xi1>
    %73 = vector.extract_strided_slice %0 {offsets = [0, 14], sizes = [2, 1], strides = [1, 1]} : vector<2x60xi32> to vector<2x1xi32>
    %74 = vector.broadcast %73 : vector<2x1xi32> to vector<2x120xi32>
    %75 = arith.cmpi eq, %74, %2 : vector<2x120xi32>
    %76 = arith.ori %72, %75 : vector<2x120xi1>
    %77 = vector.extract_strided_slice %0 {offsets = [0, 15], sizes = [2, 1], strides = [1, 1]} : vector<2x60xi32> to vector<2x1xi32>
    %78 = vector.broadcast %77 : vector<2x1xi32> to vector<2x120xi32>
    %79 = arith.cmpi eq, %78, %2 : vector<2x120xi32>
    %80 = arith.ori %76, %79 : vector<2x120xi1>
    %81 = vector.extract_strided_slice %0 {offsets = [0, 16], sizes = [2, 1], strides = [1, 1]} : vector<2x60xi32> to vector<2x1xi32>
    %82 = vector.broadcast %81 : vector<2x1xi32> to vector<2x120xi32>
    %83 = arith.cmpi eq, %82, %2 : vector<2x120xi32>
    %84 = arith.ori %80, %83 : vector<2x120xi1>
    %85 = vector.extract_strided_slice %0 {offsets = [0, 17], sizes = [2, 1], strides = [1, 1]} : vector<2x60xi32> to vector<2x1xi32>
    %86 = vector.broadcast %85 : vector<2x1xi32> to vector<2x120xi32>
    %87 = arith.cmpi eq, %86, %2 : vector<2x120xi32>
    %88 = arith.ori %84, %87 : vector<2x120xi1>
    %89 = arith.extui %88 : vector<2x120xi1> to vector<2x120xi32>
    %90 = arith.sitofp %89 : vector<2x120xi32> to vector<2x120xf32>
    %91 = arith.truncf %90 : vector<2x120xf32> to vector<2x120xbf16>
    %cst_8 = arith.constant dense<0.000000e+00> : vector<2x128xf32>
    %92 = tpu.matmul %91, %1, %cst_8 {dimension_numbers = #tpu.dot_dimension_numbers<[1], [0], [0], [1], [0, 0, 1, 1], [], []>} : vector<2x120xbf16>, vector<120x128xbf16>, vector<2x128xf32> -> vector<2x128xf32>
    %c2 = arith.constant 2 : index
    %c0_9 = arith.constant 0 : index
    %93 = vector.load %arg3[%c2, %c0_9] : memref<10x128xf32, #tpu.memory_space<vmem>>, vector<1x128xf32>
    %94 = vector.broadcast %93 : vector<1x128xf32> to vector<2x128xf32>
    %95 = arith.addf %92, %94 : vector<2x128xf32>
    %96 = arith.maximumf %65, %95 : vector<2x128xf32>
    %97 = vector.extract_strided_slice %0 {offsets = [0, 18], sizes = [2, 1], strides = [1, 1]} : vector<2x60xi32> to vector<2x1xi32>
    %98 = vector.broadcast %97 : vector<2x1xi32> to vector<2x120xi32>
    %99 = arith.cmpi eq, %98, %2 : vector<2x120xi32>
    %100 = vector.extract_strided_slice %0 {offsets = [0, 19], sizes = [2, 1], strides = [1, 1]} : vector<2x60xi32> to vector<2x1xi32>
    %101 = vector.broadcast %100 : vector<2x1xi32> to vector<2x120xi32>
    %102 = arith.cmpi eq, %101, %2 : vector<2x120xi32>
    %103 = arith.ori %99, %102 : vector<2x120xi1>
    %104 = vector.extract_strided_slice %0 {offsets = [0, 20], sizes = [2, 1], strides = [1, 1]} : vector<2x60xi32> to vector<2x1xi32>
    %105 = vector.broadcast %104 : vector<2x1xi32> to vector<2x120xi32>
    %106 = arith.cmpi eq, %105, %2 : vector<2x120xi32>
    %107 = arith.ori %103, %106 : vector<2x120xi1>
    %108 = vector.extract_strided_slice %0 {offsets = [0, 21], sizes = [2, 1], strides = [1, 1]} : vector<2x60xi32> to vector<2x1xi32>
    %109 = vector.broadcast %108 : vector<2x1xi32> to vector<2x120xi32>
    %110 = arith.cmpi eq, %109, %2 : vector<2x120xi32>
    %111 = arith.ori %107, %110 : vector<2x120xi1>
    %112 = vector.extract_strided_slice %0 {offsets = [0, 22], sizes = [2, 1], strides = [1, 1]} : vector<2x60xi32> to vector<2x1xi32>
    %113 = vector.broadcast %112 : vector<2x1xi32> to vector<2x120xi32>
    %114 = arith.cmpi eq, %113, %2 : vector<2x120xi32>
    %115 = arith.ori %111, %114 : vector<2x120xi1>
    %116 = vector.extract_strided_slice %0 {offsets = [0, 23], sizes = [2, 1], strides = [1, 1]} : vector<2x60xi32> to vector<2x1xi32>
    %117 = vector.broadcast %116 : vector<2x1xi32> to vector<2x120xi32>
    %118 = arith.cmpi eq, %117, %2 : vector<2x120xi32>
    %119 = arith.ori %115, %118 : vector<2x120xi1>
    %120 = arith.extui %119 : vector<2x120xi1> to vector<2x120xi32>
    %121 = arith.sitofp %120 : vector<2x120xi32> to vector<2x120xf32>
    %122 = arith.truncf %121 : vector<2x120xf32> to vector<2x120xbf16>
    %cst_10 = arith.constant dense<0.000000e+00> : vector<2x128xf32>
    %123 = tpu.matmul %122, %1, %cst_10 {dimension_numbers = #tpu.dot_dimension_numbers<[1], [0], [0], [1], [0, 0, 1, 1], [], []>} : vector<2x120xbf16>, vector<120x128xbf16>, vector<2x128xf32> -> vector<2x128xf32>
    %c3 = arith.constant 3 : index
    %c0_11 = arith.constant 0 : index
    %124 = vector.load %arg3[%c3, %c0_11] : memref<10x128xf32, #tpu.memory_space<vmem>>, vector<1x128xf32>
    %125 = vector.broadcast %124 : vector<1x128xf32> to vector<2x128xf32>
    %126 = arith.addf %123, %125 : vector<2x128xf32>
    %127 = arith.maximumf %96, %126 : vector<2x128xf32>
    %128 = vector.extract_strided_slice %0 {offsets = [0, 24], sizes = [2, 1], strides = [1, 1]} : vector<2x60xi32> to vector<2x1xi32>
    %129 = vector.broadcast %128 : vector<2x1xi32> to vector<2x120xi32>
    %130 = arith.cmpi eq, %129, %2 : vector<2x120xi32>
    %131 = vector.extract_strided_slice %0 {offsets = [0, 25], sizes = [2, 1], strides = [1, 1]} : vector<2x60xi32> to vector<2x1xi32>
    %132 = vector.broadcast %131 : vector<2x1xi32> to vector<2x120xi32>
    %133 = arith.cmpi eq, %132, %2 : vector<2x120xi32>
    %134 = arith.ori %130, %133 : vector<2x120xi1>
    %135 = vector.extract_strided_slice %0 {offsets = [0, 26], sizes = [2, 1], strides = [1, 1]} : vector<2x60xi32> to vector<2x1xi32>
    %136 = vector.broadcast %135 : vector<2x1xi32> to vector<2x120xi32>
    %137 = arith.cmpi eq, %136, %2 : vector<2x120xi32>
    %138 = arith.ori %134, %137 : vector<2x120xi1>
    %139 = vector.extract_strided_slice %0 {offsets = [0, 27], sizes = [2, 1], strides = [1, 1]} : vector<2x60xi32> to vector<2x1xi32>
    %140 = vector.broadcast %139 : vector<2x1xi32> to vector<2x120xi32>
    %141 = arith.cmpi eq, %140, %2 : vector<2x120xi32>
    %142 = arith.ori %138, %141 : vector<2x120xi1>
    %143 = vector.extract_strided_slice %0 {offsets = [0, 28], sizes = [2, 1], strides = [1, 1]} : vector<2x60xi32> to vector<2x1xi32>
    %144 = vector.broadcast %143 : vector<2x1xi32> to vector<2x120xi32>
    %145 = arith.cmpi eq, %144, %2 : vector<2x120xi32>
    %146 = arith.ori %142, %145 : vector<2x120xi1>
    %147 = vector.extract_strided_slice %0 {offsets = [0, 29], sizes = [2, 1], strides = [1, 1]} : vector<2x60xi32> to vector<2x1xi32>
    %148 = vector.broadcast %147 : vector<2x1xi32> to vector<2x120xi32>
    %149 = arith.cmpi eq, %148, %2 : vector<2x120xi32>
    %150 = arith.ori %146, %149 : vector<2x120xi1>
    %151 = arith.extui %150 : vector<2x120xi1> to vector<2x120xi32>
    %152 = arith.sitofp %151 : vector<2x120xi32> to vector<2x120xf32>
    %153 = arith.truncf %152 : vector<2x120xf32> to vector<2x120xbf16>
    %cst_12 = arith.constant dense<0.000000e+00> : vector<2x128xf32>
    %154 = tpu.matmul %153, %1, %cst_12 {dimension_numbers = #tpu.dot_dimension_numbers<[1], [0], [0], [1], [0, 0, 1, 1], [], []>} : vector<2x120xbf16>, vector<120x128xbf16>, vector<2x128xf32> -> vector<2x128xf32>
    %c4 = arith.constant 4 : index
    %c0_13 = arith.constant 0 : index
    %155 = vector.load %arg3[%c4, %c0_13] : memref<10x128xf32, #tpu.memory_space<vmem>>, vector<1x128xf32>
    %156 = vector.broadcast %155 : vector<1x128xf32> to vector<2x128xf32>
    %157 = arith.addf %154, %156 : vector<2x128xf32>
    %158 = arith.maximumf %127, %157 : vector<2x128xf32>
    %159 = vector.extract_strided_slice %0 {offsets = [0, 30], sizes = [2, 1], strides = [1, 1]} : vector<2x60xi32> to vector<2x1xi32>
    %160 = vector.broadcast %159 : vector<2x1xi32> to vector<2x120xi32>
    %161 = arith.cmpi eq, %160, %2 : vector<2x120xi32>
    %162 = vector.extract_strided_slice %0 {offsets = [0, 31], sizes = [2, 1], strides = [1, 1]} : vector<2x60xi32> to vector<2x1xi32>
    %163 = vector.broadcast %162 : vector<2x1xi32> to vector<2x120xi32>
    %164 = arith.cmpi eq, %163, %2 : vector<2x120xi32>
    %165 = arith.ori %161, %164 : vector<2x120xi1>
    %166 = vector.extract_strided_slice %0 {offsets = [0, 32], sizes = [2, 1], strides = [1, 1]} : vector<2x60xi32> to vector<2x1xi32>
    %167 = vector.broadcast %166 : vector<2x1xi32> to vector<2x120xi32>
    %168 = arith.cmpi eq, %167, %2 : vector<2x120xi32>
    %169 = arith.ori %165, %168 : vector<2x120xi1>
    %170 = vector.extract_strided_slice %0 {offsets = [0, 33], sizes = [2, 1], strides = [1, 1]} : vector<2x60xi32> to vector<2x1xi32>
    %171 = vector.broadcast %170 : vector<2x1xi32> to vector<2x120xi32>
    %172 = arith.cmpi eq, %171, %2 : vector<2x120xi32>
    %173 = arith.ori %169, %172 : vector<2x120xi1>
    %174 = vector.extract_strided_slice %0 {offsets = [0, 34], sizes = [2, 1], strides = [1, 1]} : vector<2x60xi32> to vector<2x1xi32>
    %175 = vector.broadcast %174 : vector<2x1xi32> to vector<2x120xi32>
    %176 = arith.cmpi eq, %175, %2 : vector<2x120xi32>
    %177 = arith.ori %173, %176 : vector<2x120xi1>
    %178 = vector.extract_strided_slice %0 {offsets = [0, 35], sizes = [2, 1], strides = [1, 1]} : vector<2x60xi32> to vector<2x1xi32>
    %179 = vector.broadcast %178 : vector<2x1xi32> to vector<2x120xi32>
    %180 = arith.cmpi eq, %179, %2 : vector<2x120xi32>
    %181 = arith.ori %177, %180 : vector<2x120xi1>
    %182 = arith.extui %181 : vector<2x120xi1> to vector<2x120xi32>
    %183 = arith.sitofp %182 : vector<2x120xi32> to vector<2x120xf32>
    %184 = arith.truncf %183 : vector<2x120xf32> to vector<2x120xbf16>
    %cst_14 = arith.constant dense<0.000000e+00> : vector<2x128xf32>
    %185 = tpu.matmul %184, %1, %cst_14 {dimension_numbers = #tpu.dot_dimension_numbers<[1], [0], [0], [1], [0, 0, 1, 1], [], []>} : vector<2x120xbf16>, vector<120x128xbf16>, vector<2x128xf32> -> vector<2x128xf32>
    %c5 = arith.constant 5 : index
    %c0_15 = arith.constant 0 : index
    %186 = vector.load %arg3[%c5, %c0_15] : memref<10x128xf32, #tpu.memory_space<vmem>>, vector<1x128xf32>
    %187 = vector.broadcast %186 : vector<1x128xf32> to vector<2x128xf32>
    %188 = arith.addf %185, %187 : vector<2x128xf32>
    %189 = arith.maximumf %158, %188 : vector<2x128xf32>
    %190 = vector.extract_strided_slice %0 {offsets = [0, 36], sizes = [2, 1], strides = [1, 1]} : vector<2x60xi32> to vector<2x1xi32>
    %191 = vector.broadcast %190 : vector<2x1xi32> to vector<2x120xi32>
    %192 = arith.cmpi eq, %191, %2 : vector<2x120xi32>
    %193 = vector.extract_strided_slice %0 {offsets = [0, 37], sizes = [2, 1], strides = [1, 1]} : vector<2x60xi32> to vector<2x1xi32>
    %194 = vector.broadcast %193 : vector<2x1xi32> to vector<2x120xi32>
    %195 = arith.cmpi eq, %194, %2 : vector<2x120xi32>
    %196 = arith.ori %192, %195 : vector<2x120xi1>
    %197 = vector.extract_strided_slice %0 {offsets = [0, 38], sizes = [2, 1], strides = [1, 1]} : vector<2x60xi32> to vector<2x1xi32>
    %198 = vector.broadcast %197 : vector<2x1xi32> to vector<2x120xi32>
    %199 = arith.cmpi eq, %198, %2 : vector<2x120xi32>
    %200 = arith.ori %196, %199 : vector<2x120xi1>
    %201 = vector.extract_strided_slice %0 {offsets = [0, 39], sizes = [2, 1], strides = [1, 1]} : vector<2x60xi32> to vector<2x1xi32>
    %202 = vector.broadcast %201 : vector<2x1xi32> to vector<2x120xi32>
    %203 = arith.cmpi eq, %202, %2 : vector<2x120xi32>
    %204 = arith.ori %200, %203 : vector<2x120xi1>
    %205 = vector.extract_strided_slice %0 {offsets = [0, 40], sizes = [2, 1], strides = [1, 1]} : vector<2x60xi32> to vector<2x1xi32>
    %206 = vector.broadcast %205 : vector<2x1xi32> to vector<2x120xi32>
    %207 = arith.cmpi eq, %206, %2 : vector<2x120xi32>
    %208 = arith.ori %204, %207 : vector<2x120xi1>
    %209 = vector.extract_strided_slice %0 {offsets = [0, 41], sizes = [2, 1], strides = [1, 1]} : vector<2x60xi32> to vector<2x1xi32>
    %210 = vector.broadcast %209 : vector<2x1xi32> to vector<2x120xi32>
    %211 = arith.cmpi eq, %210, %2 : vector<2x120xi32>
    %212 = arith.ori %208, %211 : vector<2x120xi1>
    %213 = arith.extui %212 : vector<2x120xi1> to vector<2x120xi32>
    %214 = arith.sitofp %213 : vector<2x120xi32> to vector<2x120xf32>
    %215 = arith.truncf %214 : vector<2x120xf32> to vector<2x120xbf16>
    %cst_16 = arith.constant dense<0.000000e+00> : vector<2x128xf32>
    %216 = tpu.matmul %215, %1, %cst_16 {dimension_numbers = #tpu.dot_dimension_numbers<[1], [0], [0], [1], [0, 0, 1, 1], [], []>} : vector<2x120xbf16>, vector<120x128xbf16>, vector<2x128xf32> -> vector<2x128xf32>
    %c6 = arith.constant 6 : index
    %c0_17 = arith.constant 0 : index
    %217 = vector.load %arg3[%c6, %c0_17] : memref<10x128xf32, #tpu.memory_space<vmem>>, vector<1x128xf32>
    %218 = vector.broadcast %217 : vector<1x128xf32> to vector<2x128xf32>
    %219 = arith.addf %216, %218 : vector<2x128xf32>
    %220 = arith.maximumf %189, %219 : vector<2x128xf32>
    %221 = vector.extract_strided_slice %0 {offsets = [0, 42], sizes = [2, 1], strides = [1, 1]} : vector<2x60xi32> to vector<2x1xi32>
    %222 = vector.broadcast %221 : vector<2x1xi32> to vector<2x120xi32>
    %223 = arith.cmpi eq, %222, %2 : vector<2x120xi32>
    %224 = vector.extract_strided_slice %0 {offsets = [0, 43], sizes = [2, 1], strides = [1, 1]} : vector<2x60xi32> to vector<2x1xi32>
    %225 = vector.broadcast %224 : vector<2x1xi32> to vector<2x120xi32>
    %226 = arith.cmpi eq, %225, %2 : vector<2x120xi32>
    %227 = arith.ori %223, %226 : vector<2x120xi1>
    %228 = vector.extract_strided_slice %0 {offsets = [0, 44], sizes = [2, 1], strides = [1, 1]} : vector<2x60xi32> to vector<2x1xi32>
    %229 = vector.broadcast %228 : vector<2x1xi32> to vector<2x120xi32>
    %230 = arith.cmpi eq, %229, %2 : vector<2x120xi32>
    %231 = arith.ori %227, %230 : vector<2x120xi1>
    %232 = vector.extract_strided_slice %0 {offsets = [0, 45], sizes = [2, 1], strides = [1, 1]} : vector<2x60xi32> to vector<2x1xi32>
    %233 = vector.broadcast %232 : vector<2x1xi32> to vector<2x120xi32>
    %234 = arith.cmpi eq, %233, %2 : vector<2x120xi32>
    %235 = arith.ori %231, %234 : vector<2x120xi1>
    %236 = vector.extract_strided_slice %0 {offsets = [0, 46], sizes = [2, 1], strides = [1, 1]} : vector<2x60xi32> to vector<2x1xi32>
    %237 = vector.broadcast %236 : vector<2x1xi32> to vector<2x120xi32>
    %238 = arith.cmpi eq, %237, %2 : vector<2x120xi32>
    %239 = arith.ori %235, %238 : vector<2x120xi1>
    %240 = vector.extract_strided_slice %0 {offsets = [0, 47], sizes = [2, 1], strides = [1, 1]} : vector<2x60xi32> to vector<2x1xi32>
    %241 = vector.broadcast %240 : vector<2x1xi32> to vector<2x120xi32>
    %242 = arith.cmpi eq, %241, %2 : vector<2x120xi32>
    %243 = arith.ori %239, %242 : vector<2x120xi1>
    %244 = arith.extui %243 : vector<2x120xi1> to vector<2x120xi32>
    %245 = arith.sitofp %244 : vector<2x120xi32> to vector<2x120xf32>
    %246 = arith.truncf %245 : vector<2x120xf32> to vector<2x120xbf16>
    %cst_18 = arith.constant dense<0.000000e+00> : vector<2x128xf32>
    %247 = tpu.matmul %246, %1, %cst_18 {dimension_numbers = #tpu.dot_dimension_numbers<[1], [0], [0], [1], [0, 0, 1, 1], [], []>} : vector<2x120xbf16>, vector<120x128xbf16>, vector<2x128xf32> -> vector<2x128xf32>
    %c7 = arith.constant 7 : index
    %c0_19 = arith.constant 0 : index
    %248 = vector.load %arg3[%c7, %c0_19] : memref<10x128xf32, #tpu.memory_space<vmem>>, vector<1x128xf32>
    %249 = vector.broadcast %248 : vector<1x128xf32> to vector<2x128xf32>
    %250 = arith.addf %247, %249 : vector<2x128xf32>
    %251 = arith.maximumf %220, %250 : vector<2x128xf32>
    %252 = vector.extract_strided_slice %0 {offsets = [0, 48], sizes = [2, 1], strides = [1, 1]} : vector<2x60xi32> to vector<2x1xi32>
    %253 = vector.broadcast %252 : vector<2x1xi32> to vector<2x120xi32>
    %254 = arith.cmpi eq, %253, %2 : vector<2x120xi32>
    %255 = vector.extract_strided_slice %0 {offsets = [0, 49], sizes = [2, 1], strides = [1, 1]} : vector<2x60xi32> to vector<2x1xi32>
    %256 = vector.broadcast %255 : vector<2x1xi32> to vector<2x120xi32>
    %257 = arith.cmpi eq, %256, %2 : vector<2x120xi32>
    %258 = arith.ori %254, %257 : vector<2x120xi1>
    %259 = vector.extract_strided_slice %0 {offsets = [0, 50], sizes = [2, 1], strides = [1, 1]} : vector<2x60xi32> to vector<2x1xi32>
    %260 = vector.broadcast %259 : vector<2x1xi32> to vector<2x120xi32>
    %261 = arith.cmpi eq, %260, %2 : vector<2x120xi32>
    %262 = arith.ori %258, %261 : vector<2x120xi1>
    %263 = vector.extract_strided_slice %0 {offsets = [0, 51], sizes = [2, 1], strides = [1, 1]} : vector<2x60xi32> to vector<2x1xi32>
    %264 = vector.broadcast %263 : vector<2x1xi32> to vector<2x120xi32>
    %265 = arith.cmpi eq, %264, %2 : vector<2x120xi32>
    %266 = arith.ori %262, %265 : vector<2x120xi1>
    %267 = vector.extract_strided_slice %0 {offsets = [0, 52], sizes = [2, 1], strides = [1, 1]} : vector<2x60xi32> to vector<2x1xi32>
    %268 = vector.broadcast %267 : vector<2x1xi32> to vector<2x120xi32>
    %269 = arith.cmpi eq, %268, %2 : vector<2x120xi32>
    %270 = arith.ori %266, %269 : vector<2x120xi1>
    %271 = vector.extract_strided_slice %0 {offsets = [0, 53], sizes = [2, 1], strides = [1, 1]} : vector<2x60xi32> to vector<2x1xi32>
    %272 = vector.broadcast %271 : vector<2x1xi32> to vector<2x120xi32>
    %273 = arith.cmpi eq, %272, %2 : vector<2x120xi32>
    %274 = arith.ori %270, %273 : vector<2x120xi1>
    %275 = arith.extui %274 : vector<2x120xi1> to vector<2x120xi32>
    %276 = arith.sitofp %275 : vector<2x120xi32> to vector<2x120xf32>
    %277 = arith.truncf %276 : vector<2x120xf32> to vector<2x120xbf16>
    %cst_20 = arith.constant dense<0.000000e+00> : vector<2x128xf32>
    %278 = tpu.matmul %277, %1, %cst_20 {dimension_numbers = #tpu.dot_dimension_numbers<[1], [0], [0], [1], [0, 0, 1, 1], [], []>} : vector<2x120xbf16>, vector<120x128xbf16>, vector<2x128xf32> -> vector<2x128xf32>
    %c8 = arith.constant 8 : index
    %c0_21 = arith.constant 0 : index
    %279 = vector.load %arg3[%c8, %c0_21] : memref<10x128xf32, #tpu.memory_space<vmem>>, vector<1x128xf32>
    %280 = vector.broadcast %279 : vector<1x128xf32> to vector<2x128xf32>
    %281 = arith.addf %278, %280 : vector<2x128xf32>
    %282 = arith.maximumf %251, %281 : vector<2x128xf32>
    %283 = vector.extract_strided_slice %0 {offsets = [0, 54], sizes = [2, 1], strides = [1, 1]} : vector<2x60xi32> to vector<2x1xi32>
    %284 = vector.broadcast %283 : vector<2x1xi32> to vector<2x120xi32>
    %285 = arith.cmpi eq, %284, %2 : vector<2x120xi32>
    %286 = vector.extract_strided_slice %0 {offsets = [0, 55], sizes = [2, 1], strides = [1, 1]} : vector<2x60xi32> to vector<2x1xi32>
    %287 = vector.broadcast %286 : vector<2x1xi32> to vector<2x120xi32>
    %288 = arith.cmpi eq, %287, %2 : vector<2x120xi32>
    %289 = arith.ori %285, %288 : vector<2x120xi1>
    %290 = vector.extract_strided_slice %0 {offsets = [0, 56], sizes = [2, 1], strides = [1, 1]} : vector<2x60xi32> to vector<2x1xi32>
    %291 = vector.broadcast %290 : vector<2x1xi32> to vector<2x120xi32>
    %292 = arith.cmpi eq, %291, %2 : vector<2x120xi32>
    %293 = arith.ori %289, %292 : vector<2x120xi1>
    %294 = vector.extract_strided_slice %0 {offsets = [0, 57], sizes = [2, 1], strides = [1, 1]} : vector<2x60xi32> to vector<2x1xi32>
    %295 = vector.broadcast %294 : vector<2x1xi32> to vector<2x120xi32>
    %296 = arith.cmpi eq, %295, %2 : vector<2x120xi32>
    %297 = arith.ori %293, %296 : vector<2x120xi1>
    %298 = vector.extract_strided_slice %0 {offsets = [0, 58], sizes = [2, 1], strides = [1, 1]} : vector<2x60xi32> to vector<2x1xi32>
    %299 = vector.broadcast %298 : vector<2x1xi32> to vector<2x120xi32>
    %300 = arith.cmpi eq, %299, %2 : vector<2x120xi32>
    %301 = arith.ori %297, %300 : vector<2x120xi1>
    %302 = vector.extract_strided_slice %0 {offsets = [0, 59], sizes = [2, 1], strides = [1, 1]} : vector<2x60xi32> to vector<2x1xi32>
    %303 = vector.broadcast %302 : vector<2x1xi32> to vector<2x120xi32>
    %304 = arith.cmpi eq, %303, %2 : vector<2x120xi32>
    %305 = arith.ori %301, %304 : vector<2x120xi1>
    %306 = arith.extui %305 : vector<2x120xi1> to vector<2x120xi32>
    %307 = arith.sitofp %306 : vector<2x120xi32> to vector<2x120xf32>
    %308 = arith.truncf %307 : vector<2x120xf32> to vector<2x120xbf16>
    %cst_22 = arith.constant dense<0.000000e+00> : vector<2x128xf32>
    %309 = tpu.matmul %308, %1, %cst_22 {dimension_numbers = #tpu.dot_dimension_numbers<[1], [0], [0], [1], [0, 0, 1, 1], [], []>} : vector<2x120xbf16>, vector<120x128xbf16>, vector<2x128xf32> -> vector<2x128xf32>
    %c9 = arith.constant 9 : index
    %c0_23 = arith.constant 0 : index
    %310 = vector.load %arg3[%c9, %c0_23] : memref<10x128xf32, #tpu.memory_space<vmem>>, vector<1x128xf32>
    %311 = vector.broadcast %310 : vector<1x128xf32> to vector<2x128xf32>
    %312 = arith.addf %309, %311 : vector<2x128xf32>
    %313 = arith.maximumf %282, %312 : vector<2x128xf32>
    %c0_24 = arith.constant 0 : index
    %c0_25 = arith.constant 0 : index
    %314 = vector.load %arg4[%c0_24, %c0_25] : memref<1x128xf32, #tpu.memory_space<vmem>>, vector<1x128xf32>
    %315 = vector.broadcast %314 : vector<1x128xf32> to vector<2x128xf32>
    %316 = arith.addf %313, %315 : vector<2x128xf32>
    %c0_26 = arith.constant 0 : index
    %c0_27 = arith.constant 0 : index
    %317 = vector.load %arg5[%c0_26, %c0_27] : memref<2x128xf32, #tpu.memory_space<vmem>>, vector<2x128xf32>
    tpu.vector_store %arg5[%c0_26, %c0_27], %316 {strides = array<i32>} : memref<2x128xf32, #tpu.memory_space<vmem>>, vector<2x128xf32>,
    return
  }
  func.func @transform_0(%arg0: i32) -> (i32, i32) {
    %c0_i32 = arith.constant 0 : i32
    %c0_i32_0 = arith.constant 0 : i32
    return %arg0, %c0_i32 : i32, i32
  }
  func.func @transform_1(%arg0: i32) -> (i32, i32) {
    %c0_i32 = arith.constant 0 : i32
    %c0_i32_0 = arith.constant 0 : i32
    %c0_i32_1 = arith.constant 0 : i32
    return %c0_i32, %c0_i32_0 : i32, i32
  }
  func.func @transform_2(%arg0: i32) -> (i32, i32) {
    %c0_i32 = arith.constant 0 : i32
    %c0_i32_0 = arith.constant 0 : i32
    %c0_i32_1 = arith.constant 0 : i32
    return %c0_i32, %c0_i32_0 : i32, i32
  }
  func.func @transform_3(%arg0: i32) -> (i32, i32) {
    %c0_i32 = arith.constant 0 : i32
    %c0_i32_0 = arith.constant 0 : i32
    %c0_i32_1 = arith.constant 0 : i32
    return %c0_i32, %c0_i32_0 : i32, i32
  }
  func.func @transform_4(%arg0: i32) -> (i32, i32) {
    %c0_i32 = arith.constant 0 : i32
    %c0_i32_0 = arith.constant 0 : i32
    return %arg0, %c0_i32 : i32, i32
  }
}

</mosaic_0001>

<bundles_post_ra>
// kernel: tpu_custom_call.1
= control target key start
LH: loop header
LB: loop body
LE: loop exit
PB: predicated region body
PF: predicated region fallthrough
CT: control target
= control target key end

     0   :  { %9 = vsyncpa [#allocation3], 0  ;;  %s1964_s0 = inlined_call_operand.hbm [shape: s32[2,60], index: 0, kind: input, shape index: {}]   ;;  %s1965_s1 = inlined_call_operand.hbm [shape: bf16[120,128], index: 1, kind: input, shape index: {}]   ;;  %s1966_s2 = inlined_call_operand.hbm [shape: f32[10,128], index: 2, kind: input, shape index: {}]   ;;  %s1967_s3 = inlined_call_operand.vmem [shape: f32[1,128], index: 3, kind: input, shape index: {}]   ;;  %s1968_s4 = inlined_call_operand.hbm [shape: f32[2,128], index: 4, kind: output, shape index: {}]  }
   0x1   :  { %10 = vsyncpa [#allocation6], 0 }
   0x2   :  { %11 = vsyncpa [#allocation4], 0  ;;  %s1514_s15 = smov [#allocation5]  }
   0x3   :  { %s27_s16 = sshll.u32 %s1514_s15, 4  ;;  %s28_s16 = int_to_ptr.vmem [resolvable:$true] %s27_s16 }
   0x4   :  { %s1436_s17 = scalar_lea.vmem %s28_s16, 960  ;;  %p1441_p1 = scmp.lt.s32.totalorder %s28_s16, %s28_s16 }
   0x5   :  { %p1437_p0 = scmp.ne.s32.totalorder %s28_s16, %s1436_s17  ;;  %p1442_p2 = scmp.lt.s32.totalorder %s1436_s17, %s1436_s17 }
   0x7   :  { %p1443_p3 = por %p1442_p2, %p1441_p1 }
   0x9   :  { %p1444_p4 = pnand %p1443_p3, %p1437_p0 }
   0xb   :  { %1447 = shalt.err (!%p1444_p4)
}
   0xc   :  { %s1515_s18 = smov 64   ;;  %s1516_s19 = smov 4  }
   0xd   :  { %33 = dma.hbm_to_vmem [thread:$0]  %s1965_s1, 960, %s28_s16, [#allocation6], %s1515_s18, %s1515_s18, %s1516_s19  }
   0xe   :  { %s1517_s22 = smov [#allocation2]   ;;  %s1518_s24 = smov [#allocation7]  }
   0xf   :  { %s18_s23 = sshll.u32 %s1517_s22, 4  ;;  %s39_s25 = sshll.u32 %s1518_s24, 4  ;;  %s19_s23 = int_to_ptr.vmem [resolvable:$true] %s18_s23  ;;  %s40_s25 = int_to_ptr.vmem [resolvable:$true] %s39_s25 }
  0x10   :  { %s1456_s26 = scalar_lea.vmem %s19_s23, 32  ;;  %p1461_p6 = scmp.lt.s32.totalorder %s19_s23, %s19_s23 }
  0x11   :  { %p1457_p5 = scmp.ne.s32.totalorder %s19_s23, %s1456_s26  ;;  %p1462_p7 = scmp.lt.s32.totalorder %s1456_s26, %s1456_s26 }
  0x13   :  { %p1463_p8 = por %p1462_p7, %p1461_p6 }
  0x15   :  { %p1464_p9 = pnand %p1463_p8, %p1457_p5 }
  0x17   :  { %1467 = shalt.err (!%p1464_p9)
}
  0x18   :  { %21 = dma.hbm_to_vmem [thread:$0]  %s1964_s0, 32, %s19_s23, [#allocation3]  }
  0x19   :  { %s1476_s29 = scalar_lea.vmem %s40_s25, 256  ;;  %p1481_p11 = scmp.lt.s32.totalorder %s40_s25, %s40_s25 }
  0x1a   :  { %p1477_p10 = scmp.ne.s32.totalorder %s40_s25, %s1476_s29  ;;  %p1482_p12 = scmp.lt.s32.totalorder %s1476_s29, %s1476_s29 }
  0x1c   :  { %p1483_p13 = por %p1482_p12, %p1481_p11 }
  0x1e   :  { %p1484_p0 = pnand %p1483_p13, %p1477_p10 }
  0x20   :  { %1487 = shalt.err (!%p1484_p0)
}
  0x21   :  { %s1519_s1 = smov 128   ;;  %s1520_s30 = smov 8  }
  0x22   :  { %45 = dma.hbm_to_vmem [thread:$0]  %s1966_s2, 256, %s40_s25, [#allocation6], %s1519_s1, %s1519_s1, %s1520_s30  }
  0x23   :  { %1508 = dma.done.wait [#allocation3], 32  }
  0x24   :  { %1509 = vsyncadd [#allocation3], 4294967264 }
  0x25   :  { %1510 = dma.done.wait [#allocation6], 1216  }
  0x26   :  { %1511 = vsyncadd [#allocation6], 4294966080  ;;  %v1521_v0 = vmov 2   ;;  %v1522_v1 = vmov 0   ;;  %v1618_v2 = vld [vmem:[#allocation2] sm:$0x3]  ;;  %v74_v59 = vlaneseq }
  0x27   :  { %1362 = vset.pattern.permute.xlu1 %v1521_v0  ;;  %1360 = vset.pattern.permute.xlu0 %v1522_v1  ;;  %v1420_v3 = vld [vmem:[#allocation5 + $0x38] ss:$0 sps:$4 sm:$0xff]   ;;  %vm162_vm0 = vcmask 1043456   ;;  %v1523_v4 = vmov 0.0   ;;  %v1524_v6 = vmov 3   ;;  %v1525_v7 = vmov 1  }
  0x28   :  { %86 = vperm.xlu1 %1362, %v1618_v2   ;;  %77 = vperm.xlu0 %1360, %v1618_v2   ;;  %v1624_v5 = vsel %vm162_vm0, %v1420_v3, 0  ;;  %v1631_v8 = vld [vmem:[#allocation5 + $0x30] sm:$0xff]   ;;  %v1526_v9 = vmov 6   ;;  %v1527_v10 = vmov 7   ;;  %v1639_v11 = vld [vmem:[#allocation5 + $0x28] sm:$0xff]   ;;  %v1528_v12 = vmov 4  }
  0x29   :  { %1090 = vmatprep.subr.bf16.mxu0 %v1523_v4  ;;  %1110 = vmatprep.subr.bf16.mxu1 %v1523_v4  ;;  %v1529_v13 = vmov 5   ;;  %v1647_v14 = vld [vmem:[#allocation5 + $0x20] sm:$0xff]   ;;  %vm1530_vm1 = vmmov 0   ;;  %v1531_v15 = vmov 8   ;;  %v1532_v16 = vmov 11   ;;  %v1659_v17 = vld [vmem:[#allocation5 + $0x18] sm:$0xff]  }
  0x2a   :  { %1091 = vmatpush3.bf16.msra.mxu0 %v1624_v5  ;;  %1111 = vmatpush3.bf16.msra.mxu1 %v1624_v5  ;;  %v1533_v18 = vmov 9   ;;  %v1534_v19 = vmov 14   ;;  %v1667_v20 = vld [vmem:[#allocation5 + $0x10] sm:$0xff]   ;;  %v1535_v21 = vmov 10   ;;  %v1536_v22 = vmov 19   ;;  %v1675_v23 = vld [vmem:[#allocation5 + $0x8] sm:$0xff]  }
  0x2b   :  { %1092 = vmatprep.subr.bf16.mxu0 %v1523_v4  ;;  %1112 = vmatprep.subr.bf16.mxu1 %v1523_v4  ;;  %v1537_v24 = vmov 12   ;;  %v1538_v25 = vmov 17   ;;  %v1683_v26 = vld [vmem:[#allocation5] sm:$0xff]   ;;  %v1539_v27 = vmov 13   ;;  %v1540_v28 = vmov 23   ;;  %s1583_s7 = smov [#allocation8]  }
  0x2c   :  { %1363 = vset.pattern.permute.xlu1 %v1524_v6  ;;  %1361 = vset.pattern.permute.xlu0 %v1525_v7  ;;  %v1541_v29 = vmov 15   ;;  %v1542_v30 = vmov 26   ;;  %v1543_v31 = vmov 18   ;;  %v1544_v32 = vmov 31   ;;  %s951_s8 = sshll.u32 %s1583_s7, 4  ;;  %s952_s8 = int_to_ptr.vmem [resolvable:$true] %s951_s8 }
  0x2d   :  { %91 = vperm.xlu1 %1363, %v1618_v2   ;;  %81 = vperm.xlu0 %1361, %v1618_v2   ;;  %v1545_v33 = vmov 16   ;;  %v1546_v34 = vmov 29   ;;  %v1547_v35 = vmov 20   ;;  %v1548_v36 = vmov 35   ;;  %s1488_s9 = scalar_lea.vmem %s952_s8, 32  ;;  %p1493_p2 = scmp.lt.s32.totalorder %s952_s8, %s952_s8 }
  0x2e   :  { %1093 = vmatpush3.bf16.msra.mxu0 %v1631_v8  ;;  %1113 = vmatpush3.bf16.msra.mxu1 %v1631_v8  ;;  %v1549_v37 = vmov 21   ;;  %v1550_v38 = vmov 38   ;;  %v1551_v39 = vmov 22   ;;  %v1552_v40 = vmov 43   ;;  %p1489_p1 = scmp.ne.s32.totalorder %s952_s8, %s1488_s9  ;;  %p1494_p3 = scmp.lt.s32.totalorder %s1488_s9, %s1488_s9 }
  0x2f   :  { %1094 = vmatprep.subr.bf16.mxu0 %v1523_v4  ;;  %1114 = vmatprep.subr.bf16.mxu1 %v1523_v4  ;;  %v1553_v41 = vmov 24   ;;  %v1554_v42 = vmov 41   ;;  %v1555_v43 = vmov 25   ;;  %v1556_v44 = vmov 47  }
  0x30   :  { %1106 = vmatprep.mubr.msk.bf16.mxu0 %vm1530_vm1, %v1523_v4  ;;  %1126 = vmatprep.mubr.msk.bf16.mxu1 %vm1530_vm1, %v1523_v4  ;;  %v1557_v45 = vmov 27   ;;  %v1558_v46 = vmov 50   ;;  %v1559_v47 = vmov 30   ;;  %v1560_v48 = vmov 55   ;;  %p1495_p4 = por %p1494_p3, %p1493_p2 }
  0x31   :  { %1364 = vset.pattern.permute.xlu1 %v1526_v9  ;;  %1365 = vset.pattern.permute.xlu0 %v1527_v10  ;;  %v1561_v49 = vmov 28   ;;  %v1562_v50 = vmov 53   ;;  %v1563_v51 = vmov 32   ;;  %v1564_v52 = vmov 59  }
  0x32   :  { %208 = vperm.xlu1 %1364, %v1618_v2   ;;  %212 = vperm.xlu0 %1365, %v1618_v2   ;;  %v1565_v53 = vmov 33   ;;  %v1566_v54 = vmov 34   ;;  %v1567_v55 = vmov 36   ;;  %v1568_v56 = vmov 37   ;;  %p1496_p5 = pnand %p1495_p4, %p1489_p1 }
  0x33   :  { %1095 = vmatpush3.bf16.msra.mxu0 %v1639_v11  ;;  %1115 = vmatpush3.bf16.msra.mxu1 %v1639_v11  ;;  %v1569_v60 = vmov 39   ;;  %v1721_v61 = vand.u32 127, %v74_v59  ;;  %v1570_v0 = vmov 42   ;;  %v1571_v6 = vmov 40  }
  0x34   :  { %1096 = vmatprep.subr.bf16.mxu0 %v1523_v4  ;;  %1116 = vmatprep.subr.bf16.mxu1 %v1523_v4  ;;  %v1572_v10 = vmov 44   ;;  %vm158_vm13 = vcmask 982016  }
  0x36   :  { %1366 = vset.pattern.permute.xlu1 %v1528_v12  ;;  %1368 = vset.pattern.permute.xlu0 %v1529_v13 }
  0x37   :  { %96 = vperm.xlu1 %1366, %v1618_v2   ;;  %101 = vperm.xlu0 %1368, %v1618_v2  }
  0x38   :  { %1097 = vmatpush3.bf16.msra.mxu0 %v1647_v14  ;;  %1117 = vmatpush3.bf16.msra.mxu1 %v1647_v14 }
  0x39   :  { %1098 = vmatprep.subr.bf16.mxu0 %v1523_v4  ;;  %1118 = vmatprep.subr.bf16.mxu1 %v1523_v4 }
  0x3b   :  { %1367 = vset.pattern.permute.xlu1 %v1531_v15  ;;  %1371 = vset.pattern.permute.xlu0 %v1532_v16  ;;  %v1573_v16 = vmov 45  }
  0x3c   :  { %217 = vperm.xlu1 %1367, %v1618_v2   ;;  %232 = vperm.xlu0 %1371, %v1618_v2  }
  0x3d   :  { %1099 = vmatpush3.bf16.msra.mxu0 %v1659_v17  ;;  %1119 = vmatpush3.bf16.msra.mxu1 %v1659_v17 }
  0x3e   :  { %1100 = vmatprep.subr.bf16.mxu0 %v1523_v4  ;;  %1120 = vmatprep.subr.bf16.mxu1 %v1523_v4 }
  0x40   :  { %1369 = vset.pattern.permute.xlu1 %v1533_v18  ;;  %1374 = vset.pattern.permute.xlu0 %v1534_v19  ;;  %v1574_v19 = vmov 46  }
  0x41   :  { %222 = vperm.xlu1 %1369, %v1618_v2   ;;  %298 = vperm.xlu0 %1374, %v1618_v2  }
  0x42   :  { %1101 = vmatpush3.bf16.msra.mxu0 %v1667_v20  ;;  %1121 = vmatpush3.bf16.msra.mxu1 %v1667_v20 }
  0x43   :  { %1102 = vmatprep.subr.bf16.mxu0 %v1523_v4  ;;  %1122 = vmatprep.subr.bf16.mxu1 %v1523_v4 }
  0x45   :  { %1370 = vset.pattern.permute.xlu1 %v1535_v21  ;;  %1377 = vset.pattern.permute.xlu0 %v1536_v22 }
  0x46   :  { %227 = vperm.xlu1 %1370, %v1618_v2   ;;  %374 = vperm.xlu0 %1377, %v1618_v2  }
  0x47   :  { %1103 = vmatpush3.bf16.msra.mxu0 %v1675_v23  ;;  %1123 = vmatpush3.bf16.msra.mxu1 %v1675_v23 }
  0x48   :  { %1104 = vmatprep.subr.bf16.mxu0 %v1523_v4  ;;  %1124 = vmatprep.subr.bf16.mxu1 %v1523_v4 }
  0x4a   :  { %1372 = vset.pattern.permute.xlu1 %v1537_v24  ;;  %1380 = vset.pattern.permute.xlu0 %v1538_v25  ;;  %v1575_v24 = vmov 48  }
  0x4b   :  { %289 = vperm.xlu1 %1372, %v1618_v2   ;;  %313 = vperm.xlu0 %1380, %v1618_v2  }
  0x4c   :  { %1105 = vmatpush3.bf16.msra.mxu0 %v1683_v26  ;;  %1125 = vmatpush3.bf16.msra.mxu1 %v1683_v26 }
  0x4d   :  { %1130 = vmatprep.subr.bf16.mxu0 %v1523_v4  ;;  %1150 = vmatprep.subr.bf16.mxu1 %v1523_v4 }
  0x4f   :  { %1373 = vset.pattern.permute.xlu1 %v1539_v27  ;;  %1383 = vset.pattern.permute.xlu0 %v1540_v28 }
  0x50   :  { %293 = vperm.xlu1 %1373, %v1618_v2   ;;  %394 = vperm.xlu0 %1383, %v1618_v2  }
  0x54   :  { %1375 = vset.pattern.permute.xlu1 %v1541_v29  ;;  %1386 = vset.pattern.permute.xlu0 %v1542_v30  ;;  %v1576_v29 = vmov 49  }
  0x55   :  { %303 = vperm.xlu1 %1375, %v1618_v2   ;;  %460 = vperm.xlu0 %1386, %v1618_v2  }
  0x59   :  { %1376 = vset.pattern.permute.xlu1 %v1543_v31  ;;  %1389 = vset.pattern.permute.xlu0 %v1544_v32  ;;  %v1577_v31 = vmov 51  }
  0x5a   :  { %370 = vperm.xlu1 %1376, %v1618_v2   ;;  %536 = vperm.xlu0 %1389, %v1618_v2  }
  0x5e   :  { %1378 = vset.pattern.permute.xlu1 %v1545_v33  ;;  %1392 = vset.pattern.permute.xlu0 %v1546_v34  ;;  %v1578_v34 = vmov 54  }
  0x5f   :  { %308 = vperm.xlu1 %1378, %v1618_v2   ;;  %475 = vperm.xlu0 %1392, %v1618_v2  }
  0x63   :  { %1379 = vset.pattern.permute.xlu1 %v1547_v35  ;;  %1395 = vset.pattern.permute.xlu0 %v1548_v36 }
  0x64   :  { %379 = vperm.xlu1 %1379, %v1618_v2   ;;  %556 = vperm.xlu0 %1395, %v1618_v2  }
  0x68   :  { %1381 = vset.pattern.permute.xlu1 %v1549_v37  ;;  %1398 = vset.pattern.permute.xlu0 %v1550_v38  ;;  %v1579_v37 = vmov 52  }
  0x69   :  { %384 = vperm.xlu1 %1381, %v1618_v2   ;;  %622 = vperm.xlu0 %1398, %v1618_v2  }
  0x6d   :  { %1382 = vset.pattern.permute.xlu1 %v1551_v39  ;;  %1401 = vset.pattern.permute.xlu0 %v1552_v40  ;;  %v1580_v40 = vmov 56  }
  0x6e   :  { %389 = vperm.xlu1 %1382, %v1618_v2   ;;  %698 = vperm.xlu0 %1401, %v1618_v2  }
  0x72   :  { %1384 = vset.pattern.permute.xlu1 %v1553_v41  ;;  %1404 = vset.pattern.permute.xlu0 %v1554_v42 }
  0x73   :  { %451 = vperm.xlu1 %1384, %v1618_v2   ;;  %637 = vperm.xlu0 %1404, %v1618_v2  }
  0x77   :  { %1385 = vset.pattern.permute.xlu1 %v1555_v43  ;;  %1407 = vset.pattern.permute.xlu0 %v1556_v44  ;;  %v1581_v44 = vmov 57  }
  0x78   :  { %455 = vperm.xlu1 %1385, %v1618_v2   ;;  %718 = vperm.xlu0 %1407, %v1618_v2  }
  0x7c   :  { %1387 = vset.pattern.permute.xlu1 %v1557_v45  ;;  %1410 = vset.pattern.permute.xlu0 %v1558_v46  ;;  %v1582_v46 = vmov 58  }
  0x7d   :  { %465 = vperm.xlu1 %1387, %v1618_v2   ;;  %784 = vperm.xlu0 %1410, %v1618_v2  }
  0x81   :  { %1388 = vset.pattern.permute.xlu1 %v1559_v47  ;;  %1413 = vset.pattern.permute.xlu0 %v1560_v48 }
  0x82   :  { %532 = vperm.xlu1 %1388, %v1618_v2   ;;  %860 = vperm.xlu0 %1413, %v1618_v2  }
  0x86   :  { %1390 = vset.pattern.permute.xlu1 %v1561_v49  ;;  %1416 = vset.pattern.permute.xlu0 %v1562_v50 }
  0x87   :  { %470 = vperm.xlu1 %1390, %v1618_v2   ;;  %799 = vperm.xlu0 %1416, %v1618_v2  }
  0x8b   :  { %1391 = vset.pattern.permute.xlu1 %v1563_v51  ;;  %1419 = vset.pattern.permute.xlu0 %v1564_v52 }
  0x8c   :  { %541 = vperm.xlu1 %1391, %v1618_v2   ;;  %880 = vperm.xlu0 %1419, %v1618_v2  }
  0x90   :  { %1393 = vset.pattern.permute.xlu1 %v1565_v53 }
  0x91   :  { %546 = vperm.xlu1 %1393, %v1618_v2  }
  0x95   :  { %1394 = vset.pattern.permute.xlu1 %v1566_v54 }
  0x96   :  { %551 = vperm.xlu1 %1394, %v1618_v2  }
  0x9a   :  { %1396 = vset.pattern.permute.xlu1 %v1567_v55 }
  0x9b   :  { %613 = vperm.xlu1 %1396, %v1618_v2  }
  0x9f   :  { %1397 = vset.pattern.permute.xlu1 %v1568_v56 }
  0xa0   :  { %617 = vperm.xlu1 %1397, %v1618_v2  }
  0xa3   :  { %v87_v57 = vpop.permute.xlu1 %86  ;;  %v78_v58 = vpop.permute.xlu0 %77 }
  0xa4   :  { %1399 = vset.pattern.permute.xlu1 %v1569_v60  ;;  %vm79_vm2 = vcmp.eq.s32.totalorder %v78_v58, %v1721_v61  ;;  %vm88_vm5 = vcmp.eq.s32.totalorder %v87_v57, %v1721_v61 }
  0xa5   :  { %627 = vperm.xlu1 %1399, %v1618_v2  }
  0xa8   :  { %v92_v62 = vpop.permute.xlu1 %91  ;;  %v82_v63 = vpop.permute.xlu0 %81 }
  0xa9   :  { %1400 = vset.pattern.permute.xlu1 %v1570_v0  ;;  %vm83_vm3 = vcmp.eq.s32.totalorder %v82_v63, %v1721_v61  ;;  %vm93_vm7 = vcmp.eq.s32.totalorder %v92_v62, %v1721_v61 }
  0xaa   :  { %694 = vperm.xlu1 %1400, %v1618_v2   ;;  %vm84_vm4 = vmor %vm79_vm2, %vm83_vm3 }
  0xab   :  { %vm89_vm6 = vmor %vm84_vm4, %vm88_vm5 }
  0xac   :  { %vm94_vm8 = vmor %vm89_vm6, %vm93_vm7 }
  0xad   :  { %v209_v1 = vpop.permute.xlu1 %208  ;;  %v213_v3 = vpop.permute.xlu0 %212 }
  0xae   :  { %1402 = vset.pattern.permute.xlu1 %v1571_v6  ;;  %vm210_vm14 = vcmp.eq.s32.totalorder %v209_v1, %v1721_v61  ;;  %vm214_vm15 = vcmp.eq.s32.totalorder %v213_v3, %v1721_v61 }
  0xaf   :  { %632 = vperm.xlu1 %1402, %v1618_v2   ;;  %vm215_vm3 = vmor %vm210_vm14, %vm214_vm15 }
  0xb2   :  { %v97_v7 = vpop.permute.xlu1 %96  ;;  %v102_v9 = vpop.permute.xlu0 %101 }
  0xb3   :  { %vm98_vm9 = vcmp.eq.s32.totalorder %v97_v7, %v1721_v61  ;;  %1403 = vset.pattern.permute.xlu1 %v1572_v10  ;;  %vm103_vm10 = vcmp.eq.s32.totalorder %v102_v9, %v1721_v61 }
  0xb4   :  { %vm99_vm11 = vmor %vm94_vm8, %vm98_vm9  ;;  %703 = vperm.xlu1 %1403, %v1618_v2  }
  0xb5   :  { %vm104_vm12 = vmor %vm99_vm11, %vm103_vm10 }
  0xb6   :  { %v961_v12 = vsel %vm104_vm12, 1.0, %v1523_v4 }
  0xb7   :  { %v107_v13 = vpack.c.bf16 %v961_v12, %v961_v12  ;;  %v218_v15 = vpop.permute.xlu1 %217  ;;  %v233_v21 = vpop.permute.xlu0 %232 }
  0xb8   :  { %1405 = vset.pattern.permute.xlu1 %v1573_v16  ;;  %vm219_vm0 = vcmp.eq.s32.totalorder %v218_v15, %v1721_v61  ;;  %vm234_vm5 = vcmp.eq.s32.totalorder %v233_v21, %v1721_v61 }
  0xb9   :  { %708 = vperm.xlu1 %1405, %v1618_v2   ;;  %1107 = vmatmul.mubr.msk.bf16.vlgmr.msra.gmra.mxu0 %vm158_vm13, %v107_v13  ;;  %vm220_vm4 = vmor %vm215_vm3, %vm219_vm0 }
  0xba   :  { %1131 = vmatpush3.bf16.msra.mxu0 %v1624_v5  ;;  %1146 = vmatprep.mubr.msk.bf16.mxu0 %vm1530_vm1, %v1523_v4 }
  0xbb   :  { %1132 = vmatprep.subr.bf16.mxu0 %v1523_v4 }
  0xbc   :  { %v223_v18 = vpop.permute.xlu1 %222  ;;  %v299_v32 = vpop.permute.xlu0 %298 }
  0xbd   :  { %1406 = vset.pattern.permute.xlu1 %v1574_v19  ;;  %vm224_vm2 = vcmp.eq.s32.totalorder %v223_v18, %v1721_v61  ;;  %vm300_vm14 = vcmp.eq.s32.totalorder %v299_v32, %v1721_v61 }
  0xbe   :  { %713 = vperm.xlu1 %1406, %v1618_v2   ;;  %1133 = vmatpush3.bf16.msra.mxu0 %v1631_v8  ;;  %vm225_vm6 = vmor %vm220_vm4, %vm224_vm2 }
  0xbf   :  { %1134 = vmatprep.subr.bf16.mxu0 %v1523_v4 }
  0xc1   :  { %v228_v22 = vpop.permute.xlu1 %227  ;;  %v375_v35 = vpop.permute.xlu0 %374 }
  0xc2   :  { %vm229_vm7 = vcmp.eq.s32.totalorder %v228_v22, %v1721_v61  ;;  %1408 = vset.pattern.permute.xlu1 %v1575_v24  ;;  %1135 = vmatpush3.bf16.msra.mxu0 %v1639_v11 }
  0xc3   :  { %vm230_vm8 = vmor %vm225_vm6, %vm229_vm7  ;;  %775 = vperm.xlu1 %1408, %v1618_v2   ;;  %1136 = vmatprep.subr.bf16.mxu0 %v1523_v4 }
  0xc4   :  { %vm235_vm9 = vmor %vm230_vm8, %vm234_vm5  ;;  %vm376_vm8 = vcmp.eq.s32.totalorder %v375_v35, %v1721_v61 }
  0xc5   :  { %v972_v25 = vsel %vm235_vm9, 1.0, %v1523_v4 }
  0xc6   :  { %v238_v27 = vpack.c.bf16 %v972_v25, %v972_v25  ;;  %v290_v28 = vpop.permute.xlu1 %289  ;;  %1137 = vmatpush3.bf16.msra.mxu0 %v1647_v14  ;;  %v314_v38 = vpop.permute.xlu0 %313 }
  0xc7   :  { %1409 = vset.pattern.permute.xlu1 %v1576_v29  ;;  %1138 = vmatprep.subr.bf16.mxu0 %v1523_v4  ;;  %vm291_vm11 = vcmp.eq.s32.totalorder %v290_v28, %v1721_v61  ;;  %vm315_vm2 = vcmp.eq.s32.totalorder %v314_v38, %v1721_v61 }
  0xc8   :  { %779 = vperm.xlu1 %1409, %v1618_v2   ;;  %1127 = vmatmul.mubr.msk.bf16.vlgmr.msra.gmra.mxu1 %vm158_vm13, %v238_v27 }
  0xc9   :  { %1151 = vmatpush3.bf16.msra.mxu1 %v1624_v5  ;;  %1166 = vmatprep.mubr.msk.bf16.mxu1 %vm1530_vm1, %v1523_v4 }
  0xca   :  { %1139 = vmatpush3.bf16.msra.mxu0 %v1659_v17  ;;  %1152 = vmatprep.subr.bf16.mxu1 %v1523_v4 }
  0xcb   :  { %v294_v30 = vpop.permute.xlu1 %293  ;;  %1140 = vmatprep.subr.bf16.mxu0 %v1523_v4  ;;  %v395_v47 = vpop.permute.xlu0 %394 }
  0xcc   :  { %1411 = vset.pattern.permute.xlu1 %v1577_v31  ;;  %vm295_vm10 = vcmp.eq.s32.totalorder %v294_v30, %v1721_v61 }
  0xcd   :  { %789 = vperm.xlu1 %1411, %v1618_v2   ;;  %1153 = vmatpush3.bf16.msra.mxu1 %v1631_v8  ;;  %vm296_vm12 = vmor %vm291_vm11, %vm295_vm10 }
  0xce   :  { %1141 = vmatpush3.bf16.msra.mxu0 %v1667_v20  ;;  %1154 = vmatprep.subr.bf16.mxu1 %v1523_v4  ;;  %vm301_vm0 = vmor %vm296_vm12, %vm300_vm14  ;;  %vm396_vm14 = vcmp.eq.s32.totalorder %v395_v47, %v1721_v61 }
  0xcf   :  { %1142 = vmatprep.subr.bf16.mxu0 %v1523_v4 }
  0xd0   :  { %v304_v33 = vpop.permute.xlu1 %303  ;;  %v461_v52 = vpop.permute.xlu0 %460 }
  0xd1   :  { %1412 = vset.pattern.permute.xlu1 %v1578_v34  ;;  %1155 = vmatpush3.bf16.msra.mxu1 %v1639_v11  ;;  %vm305_vm15 = vcmp.eq.s32.totalorder %v304_v33, %v1721_v61 }
  0xd2   :  { %856 = vperm.xlu1 %1412, %v1618_v2   ;;  %1143 = vmatpush3.bf16.msra.mxu0 %v1675_v23  ;;  %vm306_vm3 = vmor %vm301_vm0, %vm305_vm15 }
  0xd3   :  { %1156 = vmatprep.subr.bf16.mxu1 %v1523_v4  ;;  %1144 = vmatprep.subr.bf16.mxu0 %v1523_v4 }
  0xd5   :  { %v371_v36 = vpop.permute.xlu1 %370  ;;  %1157 = vmatpush3.bf16.msra.mxu1 %v1647_v14  ;;  %v537_v54 = vpop.permute.xlu0 %536 }
  0xd6   :  { %1414 = vset.pattern.permute.xlu1 %v1579_v37  ;;  %1145 = vmatpush3.bf16.msra.mxu0 %v1683_v26  ;;  %vm372_vm7 = vcmp.eq.s32.totalorder %v371_v36, %v1721_v61 }
  0xd7   :  { %794 = vperm.xlu1 %1414, %v1618_v2   ;;  %1158 = vmatprep.subr.bf16.mxu1 %v1523_v4  ;;  %vm377_vm11 = vmor %vm372_vm7, %vm376_vm8  ;;  %vm462_vm7 = vcmp.eq.s32.totalorder %v461_v52, %v1721_v61 }
  0xd8   :  { %1170 = vmatprep.subr.bf16.mxu0 %v1523_v4 }
  0xd9   :  { %1159 = vmatpush3.bf16.msra.mxu1 %v1659_v17 }
  0xda   :  { %v309_v39 = vpop.permute.xlu1 %308  ;;  %1160 = vmatprep.subr.bf16.mxu1 %v1523_v4  ;;  %v476_v56 = vpop.permute.xlu0 %475 }
  0xdb   :  { %vm310_vm4 = vcmp.eq.s32.totalorder %v309_v39, %v1721_v61  ;;  %1415 = vset.pattern.permute.xlu1 %v1580_v40 }
  0xdc   :  { %vm311_vm5 = vmor %vm306_vm3, %vm310_vm4  ;;  %865 = vperm.xlu1 %1415, %v1618_v2  }
  0xdd   :  { %vm316_vm6 = vmor %vm311_vm5, %vm315_vm2  ;;  %1161 = vmatpush3.bf16.msra.mxu1 %v1667_v20 }
  0xde   :  { %v975_v41 = vsel %vm316_vm6, 1.0, %v1523_v4  ;;  %1162 = vmatprep.subr.bf16.mxu1 %v1523_v4 }
  0xdf   :  { %v319_v42 = vpack.c.bf16 %v975_v41, %v975_v41  ;;  %v380_v43 = vpop.permute.xlu1 %379  ;;  %v557_v63 = vpop.permute.xlu0 %556  ;;  %v962_v41 = vld [vmem:[#allocation7] ss:$0 sm:$0xff] }
  0xe0   :  { %1417 = vset.pattern.permute.xlu1 %v1581_v44  ;;  %vm381_vm9 = vcmp.eq.s32.totalorder %v380_v43, %v1721_v61  ;;  %v973_v43 = vld [vmem:[#allocation7 + $0x1] ss:$0 sm:$0xff] }
  0xe1   :  { %870 = vperm.xlu1 %1417, %v1618_v2   ;;  %1147 = vmatmul.mubr.msk.bf16.vlgmr.msra.gmra.mxu0 %vm158_vm13, %v319_v42  ;;  %vm382_vm12 = vmor %vm377_vm11, %vm381_vm9 }
  0xe2   :  { %1163 = vmatpush3.bf16.msra.mxu1 %v1675_v23  ;;  %1171 = vmatpush3.bf16.msra.mxu0 %v1624_v5 }
  0xe3   :  { %1164 = vmatprep.subr.bf16.mxu1 %v1523_v4  ;;  %1172 = vmatprep.subr.bf16.mxu0 %v1523_v4 }
  0xe4   :  { %v385_v45 = vpop.permute.xlu1 %384  ;;  %1186 = vmatprep.mubr.msk.bf16.mxu0 %vm1530_vm1, %v1523_v4  ;;  %v623_v9 = vpop.permute.xlu0 %622 }
  0xe5   :  { %1418 = vset.pattern.permute.xlu1 %v1582_v46  ;;  %vm386_vm10 = vcmp.eq.s32.totalorder %v385_v45, %v1721_v61 }
  0xe6   :  { %875 = vperm.xlu1 %1418, %v1618_v2   ;;  %1165 = vmatpush3.bf16.msra.mxu1 %v1683_v26  ;;  %vm387_vm15 = vmor %vm382_vm12, %vm386_vm10  ;;  %vm477_vm10 = vcmp.eq.s32.totalorder %v476_v56, %v1721_v61 }
  0xe7   :  { %1173 = vmatpush3.bf16.msra.mxu0 %v1631_v8  ;;  %1190 = vmatprep.subr.bf16.mxu1 %v1523_v4 }
  0xe8   :  { %1174 = vmatprep.subr.bf16.mxu0 %v1523_v4 }
  0xe9   :  { %v390_v48 = vpop.permute.xlu1 %389  ;;  %v699_v12 = vpop.permute.xlu0 %698 }
  0xea   :  { %vm391_vm0 = vcmp.eq.s32.totalorder %v390_v48, %v1721_v61 }
  0xeb   :  { %vm392_vm2 = vmor %vm387_vm15, %vm391_vm0  ;;  %1175 = vmatpush3.bf16.msra.mxu0 %v1639_v11 }
  0xec   :  { %vm397_vm3 = vmor %vm392_vm2, %vm396_vm14  ;;  %1176 = vmatprep.subr.bf16.mxu0 %v1523_v4  ;;  %vm538_vm2 = vcmp.eq.s32.totalorder %v537_v54, %v1721_v61 }
  0xed   :  { %v978_v2 = vsel %vm397_vm3, 1.0, %v1523_v4 }
  0xee   :  { %v400_v49 = vpack.c.bf16 %v978_v2, %v978_v2  ;;  %v452_v50 = vpop.permute.xlu1 %451  ;;  %v638_v15 = vpop.permute.xlu0 %637 }
  0xef   :  { %1177 = vmatpush3.bf16.msra.mxu0 %v1647_v14  ;;  %vm453_vm5 = vcmp.eq.s32.totalorder %v452_v50, %v1721_v61 }
  0xf0   :  { %1167 = vmatmul.mubr.msk.bf16.vlgmr.msra.gmra.mxu1 %vm158_vm13, %v400_v49  ;;  %1178 = vmatprep.subr.bf16.mxu0 %v1523_v4  ;;  %v976_v49 = vld [vmem:[#allocation7 + $0x2] ss:$0 sm:$0xff] }
  0xf1   :  { %1191 = vmatpush3.bf16.msra.mxu1 %v1624_v5  ;;  %1206 = vmatprep.mubr.msk.bf16.mxu1 %vm1530_vm1, %v1523_v4 }
  0xf2   :  { %1192 = vmatprep.subr.bf16.mxu1 %v1523_v4 }
  0xf3   :  { %v456_v51 = vpop.permute.xlu1 %455  ;;  %1179 = vmatpush3.bf16.msra.mxu0 %v1659_v17  ;;  %v719_v24 = vpop.permute.xlu0 %718 }
  0xf4   :  { %1180 = vmatprep.subr.bf16.mxu0 %v1523_v4  ;;  %vm457_vm4 = vcmp.eq.s32.totalorder %v456_v51, %v1721_v61 }
  0xf5   :  { %1193 = vmatpush3.bf16.msra.mxu1 %v1631_v8  ;;  %vm458_vm6 = vmor %vm453_vm5, %vm457_vm4 }
  0xf6   :  { %1194 = vmatprep.subr.bf16.mxu1 %v1523_v4  ;;  %vm463_vm9 = vmor %vm458_vm6, %vm462_vm7  ;;  %vm558_vm7 = vcmp.eq.s32.totalorder %v557_v63, %v1721_v61  ;;  %v982_v63 = vld [vmem:[#allocation7 + $0x4] ss:$0 sm:$0xff] }
  0xf7   :  { %1181 = vmatpush3.bf16.msra.mxu0 %v1667_v20 }
  0xf8   :  { %v466_v53 = vpop.permute.xlu1 %465  ;;  %1182 = vmatprep.subr.bf16.mxu0 %v1523_v4  ;;  %v785_v31 = vpop.permute.xlu0 %784 }
  0xf9   :  { %1195 = vmatpush3.bf16.msra.mxu1 %v1639_v11  ;;  %vm467_vm8 = vcmp.eq.s32.totalorder %v466_v53, %v1721_v61 }
  0xfa   :  { %1196 = vmatprep.subr.bf16.mxu1 %v1523_v4  ;;  %vm468_vm11 = vmor %vm463_vm9, %vm467_vm8 }
  0xfb   :  { %1183 = vmatpush3.bf16.msra.mxu0 %v1675_v23 }
  0xfc   :  { %1184 = vmatprep.subr.bf16.mxu0 %v1523_v4 }
  0xfd   :  { %v533_v55 = vpop.permute.xlu1 %532  ;;  %1197 = vmatpush3.bf16.msra.mxu1 %v1647_v14  ;;  %v861_v32 = vpop.permute.xlu0 %860 }
  0xfe   :  { %1198 = vmatprep.subr.bf16.mxu1 %v1523_v4  ;;  %vm534_vm0 = vcmp.eq.s32.totalorder %v533_v55, %v1721_v61  ;;  %v979_v55 = vld [vmem:[#allocation7 + $0x3] ss:$0 sm:$0xff] }
  0xff   :  { %1185 = vmatpush3.bf16.msra.mxu0 %v1683_v26  ;;  %vm539_vm5 = vmor %vm534_vm0, %vm538_vm2  ;;  %vm624_vm0 = vcmp.eq.s32.totalorder %v623_v9, %v1721_v61 }
 0x100   :  { %1210 = vmatprep.subr.bf16.mxu0 %v1523_v4 }
 0x101   :  { %1199 = vmatpush3.bf16.msra.mxu1 %v1659_v17 }
 0x102   :  { %v471_v57 = vpop.permute.xlu1 %470  ;;  %1200 = vmatprep.subr.bf16.mxu1 %v1523_v4 }
 0x103   :  { %vm472_vm12 = vcmp.eq.s32.totalorder %v471_v57, %v1721_v61 }
 0x104   :  { %vm473_vm14 = vmor %vm468_vm11, %vm472_vm12 }
 0x105   :  { %vm478_vm15 = vmor %vm473_vm14, %vm477_vm10  ;;  %1201 = vmatpush3.bf16.msra.mxu1 %v1667_v20 }
 0x106   :  { %v981_v58 = vsel %vm478_vm15, 1.0, %v1523_v4  ;;  %1202 = vmatprep.subr.bf16.mxu1 %v1523_v4 }
 0x107   :  { %v481_v59 = vpack.c.bf16 %v981_v58, %v981_v58  ;;  %v542_v60 = vpop.permute.xlu1 %541 }
 0x108   :  { %vm543_vm3 = vcmp.eq.s32.totalorder %v542_v60, %v1721_v61 }
 0x109   :  { %1187 = vmatmul.mubr.msk.bf16.vlgmr.msra.gmra.mxu0 %vm158_vm13, %v481_v59  ;;  %1203 = vmatpush3.bf16.msra.mxu1 %v1675_v23  ;;  %vm544_vm6 = vmor %vm539_vm5, %vm543_vm3 }
 0x10a   :  { %1211 = vmatpush3.bf16.msra.mxu0 %v1624_v5  ;;  %1204 = vmatprep.subr.bf16.mxu1 %v1523_v4 }
 0x10b   :  { %1212 = vmatprep.subr.bf16.mxu0 %v1523_v4  ;;  %1226 = vmatprep.mubr.msk.bf16.mxu0 %vm1530_vm1, %v1523_v4 }
 0x10c   :  { %v547_v62 = vpop.permute.xlu1 %546 }
 0x10d   :  { %1205 = vmatpush3.bf16.msra.mxu1 %v1683_v26  ;;  %vm548_vm4 = vcmp.eq.s32.totalorder %v547_v62, %v1721_v61 }
 0x10e   :  { %1213 = vmatpush3.bf16.msra.mxu0 %v1631_v8  ;;  %1230 = vmatprep.subr.bf16.mxu1 %v1523_v4  ;;  %vm549_vm8 = vmor %vm544_vm6, %vm548_vm4  ;;  %vm639_vm4 = vcmp.eq.s32.totalorder %v638_v15, %v1721_v61 }
 0x10f   :  { %1214 = vmatprep.subr.bf16.mxu0 %v1523_v4 }
 0x111   :  { %v552_v0 = vpop.permute.xlu1 %551 }
 0x112   :  { %vm553_vm9 = vcmp.eq.s32.totalorder %v552_v0, %v1721_v61  ;;  %1215 = vmatpush3.bf16.msra.mxu0 %v1639_v11 }
 0x113   :  { %vm554_vm10 = vmor %vm549_vm8, %vm553_vm9  ;;  %1216 = vmatprep.subr.bf16.mxu0 %v1523_v4 }
 0x114   :  { %vm559_vm11 = vmor %vm554_vm10, %vm558_vm7  ;;  %vm700_vm10 = vcmp.eq.s32.totalorder %v699_v12, %v1721_v61 }
 0x115   :  { %v984_v1 = vsel %vm559_vm11, 1.0, %v1523_v4 }
 0x116   :  { %v562_v3 = vpack.c.bf16 %v984_v1, %v984_v1  ;;  %v614_v6 = vpop.permute.xlu1 %613  ;;  %1217 = vmatpush3.bf16.msra.mxu0 %v1647_v14 }
 0x117   :  { %1218 = vmatprep.subr.bf16.mxu0 %v1523_v4  ;;  %vm615_vm14 = vcmp.eq.s32.totalorder %v614_v6, %v1721_v61 }
 0x118   :  { %1207 = vmatmul.mubr.msk.bf16.vlgmr.msra.gmra.mxu1 %vm158_vm13, %v562_v3 }
 0x119   :  { %1231 = vmatpush3.bf16.msra.mxu1 %v1624_v5  ;;  %1246 = vmatprep.mubr.msk.bf16.mxu1 %vm1530_vm1, %v1523_v4 }
 0x11a   :  { %1219 = vmatpush3.bf16.msra.mxu0 %v1659_v17  ;;  %1232 = vmatprep.subr.bf16.mxu1 %v1523_v4 }
 0x11b   :  { %v618_v7 = vpop.permute.xlu1 %617  ;;  %1220 = vmatprep.subr.bf16.mxu0 %v1523_v4 }
 0x11c   :  { %vm619_vm12 = vcmp.eq.s32.totalorder %v618_v7, %v1721_v61 }
 0x11d   :  { %1233 = vmatpush3.bf16.msra.mxu1 %v1631_v8  ;;  %vm620_vm15 = vmor %vm615_vm14, %vm619_vm12 }
 0x11e   :  { %1221 = vmatpush3.bf16.msra.mxu0 %v1667_v20  ;;  %1234 = vmatprep.subr.bf16.mxu1 %v1523_v4  ;;  %vm625_vm3 = vmor %vm620_vm15, %vm624_vm0  ;;  %vm720_vm0 = vcmp.eq.s32.totalorder %v719_v24, %v1721_v61 }
 0x11f   :  { %1222 = vmatprep.subr.bf16.mxu0 %v1523_v4 }
 0x120   :  { %v628_v10 = vpop.permute.xlu1 %627 }
 0x121   :  { %1235 = vmatpush3.bf16.msra.mxu1 %v1639_v11  ;;  %vm629_vm2 = vcmp.eq.s32.totalorder %v628_v10, %v1721_v61  ;;  %v985_v10 = vld [vmem:[#allocation7 + $0x5] ss:$0 sm:$0xff] }
 0x122   :  { %1223 = vmatpush3.bf16.msra.mxu0 %v1675_v23  ;;  %1236 = vmatprep.subr.bf16.mxu1 %v1523_v4  ;;  %vm630_vm5 = vmor %vm625_vm3, %vm629_vm2 }
 0x123   :  { %1224 = vmatprep.subr.bf16.mxu0 %v1523_v4 }
 0x125   :  { %v695_v13 = vpop.permute.xlu1 %694  ;;  %1237 = vmatpush3.bf16.msra.mxu1 %v1647_v14 }
 0x126   :  { %1225 = vmatpush3.bf16.msra.mxu0 %v1683_v26  ;;  %1238 = vmatprep.subr.bf16.mxu1 %v1523_v4  ;;  %vm696_vm9 = vcmp.eq.s32.totalorder %v695_v13, %v1721_v61 }
 0x127   :  { %1250 = vmatprep.subr.bf16.mxu0 %v1523_v4  ;;  %vm701_vm14 = vmor %vm696_vm9, %vm700_vm10 }
 0x129   :  { %1239 = vmatpush3.bf16.msra.mxu1 %v1659_v17 }
 0x12a   :  { %v633_v16 = vpop.permute.xlu1 %632  ;;  %1240 = vmatprep.subr.bf16.mxu1 %v1523_v4 }
 0x12b   :  { %vm634_vm6 = vcmp.eq.s32.totalorder %v633_v16, %v1721_v61 }
 0x12c   :  { %vm635_vm7 = vmor %vm630_vm5, %vm634_vm6 }
 0x12d   :  { %vm640_vm8 = vmor %vm635_vm7, %vm639_vm4  ;;  %1241 = vmatpush3.bf16.msra.mxu1 %v1667_v20 }
 0x12e   :  { %v987_v18 = vsel %vm640_vm8, 1.0, %v1523_v4  ;;  %1242 = vmatprep.subr.bf16.mxu1 %v1523_v4  ;;  %vm786_vm8 = vcmp.eq.s32.totalorder %v785_v31, %v1721_v61 }
 0x12f   :  { %v643_v19 = vpack.c.bf16 %v987_v18, %v987_v18  ;;  %v704_v21 = vpop.permute.xlu1 %703 }
 0x130   :  { %vm705_vm11 = vcmp.eq.s32.totalorder %v704_v21, %v1721_v61 }
 0x131   :  { %1227 = vmatmul.mubr.msk.bf16.vlgmr.msra.gmra.mxu0 %vm158_vm13, %v643_v19  ;;  %1243 = vmatpush3.bf16.msra.mxu1 %v1675_v23  ;;  %vm706_vm15 = vmor %vm701_vm14, %vm705_vm11 }
 0x132   :  { %1251 = vmatpush3.bf16.msra.mxu0 %v1624_v5  ;;  %1244 = vmatprep.subr.bf16.mxu1 %v1523_v4 }
 0x133   :  { %1252 = vmatprep.subr.bf16.mxu0 %v1523_v4  ;;  %1266 = vmatprep.mubr.msk.bf16.mxu0 %vm1530_vm1, %v1523_v4 }
 0x134   :  { %v709_v22 = vpop.permute.xlu1 %708 }
 0x135   :  { %1245 = vmatpush3.bf16.msra.mxu1 %v1683_v26  ;;  %vm710_vm12 = vcmp.eq.s32.totalorder %v709_v22, %v1721_v61 }
 0x136   :  { %1253 = vmatpush3.bf16.msra.mxu0 %v1631_v8  ;;  %1270 = vmatprep.subr.bf16.mxu1 %v1523_v4  ;;  %vm711_vm2 = vmor %vm706_vm15, %vm710_vm12 }
 0x137   :  { %1254 = vmatprep.subr.bf16.mxu0 %v1523_v4 }
 0x139   :  { %v714_v25 = vpop.permute.xlu1 %713 }
 0x13a   :  { %vm715_vm3 = vcmp.eq.s32.totalorder %v714_v25, %v1721_v61  ;;  %1255 = vmatpush3.bf16.msra.mxu0 %v1639_v11 }
 0x13b   :  { %vm716_vm4 = vmor %vm711_vm2, %vm715_vm3  ;;  %1256 = vmatprep.subr.bf16.mxu0 %v1523_v4  ;;  %vm862_vm3 = vcmp.eq.s32.totalorder %v861_v32, %v1721_v61 }
 0x13c   :  { %vm721_vm5 = vmor %vm716_vm4, %vm720_vm0 }
 0x13d   :  { %v990_v27 = vsel %vm721_vm5, 1.0, %v1523_v4 }
 0x13e   :  { %v724_v28 = vpack.c.bf16 %v990_v27, %v990_v27  ;;  %v776_v29 = vpop.permute.xlu1 %775  ;;  %1257 = vmatpush3.bf16.msra.mxu0 %v1647_v14 }
 0x13f   :  { %1258 = vmatprep.subr.bf16.mxu0 %v1523_v4  ;;  %vm777_vm6 = vcmp.eq.s32.totalorder %v776_v29, %v1721_v61 }
 0x140   :  { %1247 = vmatmul.mubr.msk.bf16.vlgmr.msra.gmra.mxu1 %vm158_vm13, %v724_v28 }
 0x141   :  { %1271 = vmatpush3.bf16.msra.mxu1 %v1624_v5  ;;  %1286 = vmatprep.mubr.msk.bf16.mxu1 %vm1530_vm1, %v1523_v4 }
 0x142   :  { %1259 = vmatpush3.bf16.msra.mxu0 %v1659_v17  ;;  %1272 = vmatprep.subr.bf16.mxu1 %v1523_v4 }
 0x143   :  { %v780_v30 = vpop.permute.xlu1 %779  ;;  %1260 = vmatprep.subr.bf16.mxu0 %v1523_v4 }
 0x144   :  { %vm781_vm1 = vcmp.eq.s32.totalorder %v780_v30, %v1721_v61 }
 0x145   :  { %1273 = vmatpush3.bf16.msra.mxu1 %v1631_v8  ;;  %vm782_vm7 = vmor %vm777_vm6, %vm781_vm1 }
 0x146   :  { %1261 = vmatpush3.bf16.msra.mxu0 %v1667_v20  ;;  %1274 = vmatprep.subr.bf16.mxu1 %v1523_v4  ;;  %vm787_vm10 = vmor %vm782_vm7, %vm786_vm8 }
 0x147   :  { %1262 = vmatprep.subr.bf16.mxu0 %v1523_v4 }
 0x148   :  { %v790_v5 = vpop.permute.xlu1 %789 }
 0x149   :  { %1275 = vmatpush3.bf16.msra.mxu1 %v1639_v11  ;;  %v800_v11 = vpop.permute.xlu0 %799  ;;  %vm791_vm9 = vcmp.eq.s32.totalorder %v790_v5, %v1721_v61 }
 0x14a   :  { %1263 = vmatpush3.bf16.msra.mxu0 %v1675_v23  ;;  %1276 = vmatprep.subr.bf16.mxu1 %v1523_v4  ;;  %vm801_vm11 = vcmp.eq.s32.totalorder %v800_v11, %v1721_v61  ;;  %vm792_vm12 = vmor %vm787_vm10, %vm791_vm9 }
 0x14b   :  { %1264 = vmatprep.subr.bf16.mxu0 %v1523_v4 }
 0x14d   :  { %v857_v8 = vpop.permute.xlu1 %856  ;;  %1277 = vmatpush3.bf16.msra.mxu1 %v1647_v14 }
 0x14e   :  { %1265 = vmatpush3.bf16.msra.mxu0 %v1683_v26  ;;  %1278 = vmatprep.subr.bf16.mxu1 %v1523_v4  ;;  %vm858_vm2 = vcmp.eq.s32.totalorder %v857_v8, %v1721_v61  ;;  %v988_v8 = vld [vmem:[#allocation7 + $0x6] ss:$0 sm:$0xff] }
 0x14f   :  { %vm863_vm1 = vmor %vm858_vm2, %vm862_vm3 }
 0x151   :  { %1279 = vmatpush3.bf16.msra.mxu1 %v1659_v17 }
 0x152   :  { %v795_v33 = vpop.permute.xlu1 %794  ;;  %1280 = vmatprep.subr.bf16.mxu1 %v1523_v4 }
 0x153   :  { %vm796_vm14 = vcmp.eq.s32.totalorder %v795_v33, %v1721_v61  ;;  %v991_v33 = vld [vmem:[#allocation7 + $0x7] ss:$0 sm:$0xff] }
 0x154   :  { %vm797_vm15 = vmor %vm792_vm12, %vm796_vm14 }
 0x155   :  { %vm802_vm0 = vmor %vm797_vm15, %vm801_vm11  ;;  %1281 = vmatpush3.bf16.msra.mxu1 %v1667_v20  ;;  %v881_v20 = vpop.permute.xlu0 %880 }
 0x156   :  { %v993_v14 = vsel %vm802_vm0, 1.0, %v1523_v4  ;;  %1282 = vmatprep.subr.bf16.mxu1 %v1523_v4  ;;  %vm882_vm7 = vcmp.eq.s32.totalorder %v881_v20, %v1721_v61 }
 0x157   :  { %v805_v34 = vpack.c.bf16 %v993_v14, %v993_v14  ;;  %v866_v35 = vpop.permute.xlu1 %865 }
 0x158   :  { %vm867_vm4 = vcmp.eq.s32.totalorder %v866_v35, %v1721_v61 }
 0x159   :  { %1267 = vmatmul.mubr.msk.bf16.vlgmr.msra.gmra.mxu0 %vm158_vm13, %v805_v34  ;;  %1283 = vmatpush3.bf16.msra.mxu1 %v1675_v23  ;;  %vm868_vm6 = vmor %vm863_vm1, %vm867_vm4  ;;  %v994_v34 = vld [vmem:[#allocation7 + $0x8] ss:$0 sm:$0xff] }
 0x15a   :  { %1284 = vmatprep.subr.bf16.mxu1 %v1523_v4 }
 0x15c   :  { %v871_v17 = vpop.permute.xlu1 %870 }
 0x15d   :  { %1285 = vmatpush3.bf16.msra.mxu1 %v1683_v26  ;;  %vm872_vm5 = vcmp.eq.s32.totalorder %v871_v17, %v1721_v61 }
 0x15e   :  { %vm873_vm8 = vmor %vm868_vm6, %vm872_vm5 }
 0x161   :  { %v876_v36 = vpop.permute.xlu1 %875 }
 0x162   :  { %vm877_vm9 = vcmp.eq.s32.totalorder %v876_v36, %v1721_v61  ;;  %v997_v36 = vld [vmem:[#allocation7 + $0x9] ss:$0 sm:$0xff] }
 0x163   :  { %vm878_vm10 = vmor %vm873_vm8, %vm877_vm9 }
 0x164   :  { %vm883_vm11 = vmor %vm878_vm10, %vm882_vm7 }
 0x165   :  { %v996_v23 = vsel %vm883_vm11, 1.0, %v1523_v4 }
 0x166   :  { %v886_v37 = vpack.c.bf16 %v996_v23, %v996_v23 }
 0x168   :  { %1287 = vmatmul.mubr.msk.bf16.vlgmr.msra.gmra.mxu1 %vm158_vm13, %v886_v37 }
 0x179   :  { %v200_v26 = vpop.f32.mrf.mxu0 }
 0x17a   :  { %v201_v42 = vadd.f32 %v962_v41, %v200_v26 }
 0x17b   :  { %v1108_v38 = vpop.f32.mrf.mxu0 }
 0x17c   :  { %v206_v45 = vmax.f32 %v201_v42, -1e+30 }
 0x17d   :  { %v203_v39 = vpop.f32.mrf.mxu0 }
 0x17f   :  { %v1109_v40 = vpop.f32.mrf.mxu0 }
 0x180   :  { %v999_v40 = vld [vmem:[%s1967_s3] ss:$0 sm:$0xff] }
 0x188   :  { %v281_v44 = vpop.f32.mrf.mxu1 }
 0x189   :  { %v282_v46 = vadd.f32 %v973_v43, %v281_v44 }
 0x18a   :  { %v1128_v47 = vpop.f32.mrf.mxu1 }
 0x18b   :  { %v287_v48 = vmax.f32 %v206_v45, %v282_v46 }
 0x18c   :  { %v284_v61 = vpop.f32.mrf.mxu1 }
 0x18e   :  { %v1129_v2 = vpop.f32.mrf.mxu1 }
 0x1a1   :  { %v362_v50 = vpop.f32.mrf.mxu0 }
 0x1a2   :  { %v363_v4 = vadd.f32 %v976_v49, %v362_v50 }
 0x1a3   :  { %v1148_v51 = vpop.f32.mrf.mxu0 }
 0x1a4   :  { %v368_v52 = vmax.f32 %v287_v48, %v363_v4 }
 0x1a5   :  { %v365_v53 = vpop.f32.mrf.mxu0 }
 0x1a7   :  { %v1149_v54 = vpop.f32.mrf.mxu0 }
 0x1b0   :  { %v443_v56 = vpop.f32.mrf.mxu1 }
 0x1b1   :  { %v444_v57 = vadd.f32 %v979_v55, %v443_v56 }
 0x1b2   :  { %v1168_v58 = vpop.f32.mrf.mxu1 }
 0x1b3   :  { %v449_v59 = vmax.f32 %v368_v52, %v444_v57 }
 0x1b4   :  { %v446_v60 = vpop.f32.mrf.mxu1 }
 0x1b6   :  { %v1169_v62 = vpop.f32.mrf.mxu1 }
 0x1c9   :  { %v524_v0 = vpop.f32.mrf.mxu0 }
 0x1ca   :  { %v525_v1 = vadd.f32 %v982_v63, %v524_v0 }
 0x1cb   :  { %v1188_v3 = vpop.f32.mrf.mxu0 }
 0x1cc   :  { %v530_v6 = vmax.f32 %v449_v59, %v525_v1 }
 0x1cd   :  { %v527_v7 = vpop.f32.mrf.mxu0 }
 0x1cf   :  { %v1189_v9 = vpop.f32.mrf.mxu0 }
 0x1d8   :  { %v605_v12 = vpop.f32.mrf.mxu1 }
 0x1d9   :  { %v606_v13 = vadd.f32 %v985_v10, %v605_v12 }
 0x1da   :  { %v1208_v15 = vpop.f32.mrf.mxu1 }
 0x1db   :  { %v611_v16 = vmax.f32 %v530_v6, %v606_v13 }
 0x1dc   :  { %v608_v18 = vpop.f32.mrf.mxu1 }
 0x1de   :  { %v1209_v19 = vpop.f32.mrf.mxu1 }
 0x1f1   :  { %v686_v21 = vpop.f32.mrf.mxu0 }
 0x1f2   :  { %v687_v14 = vadd.f32 %v988_v8, %v686_v21 }
 0x1f3   :  { %v1228_v22 = vpop.f32.mrf.mxu0 }
 0x1f4   :  { %v692_v17 = vmax.f32 %v611_v16, %v687_v14 }
 0x1f5   :  { %v689_v24 = vpop.f32.mrf.mxu0 }
 0x1f7   :  { %v1229_v25 = vpop.f32.mrf.mxu0 }
 0x200   :  { %v767_v27 = vpop.f32.mrf.mxu1 }
 0x201   :  { %v768_v35 = vadd.f32 %v991_v33, %v767_v27 }
 0x202   :  { %v1248_v28 = vpop.f32.mrf.mxu1 }
 0x203   :  { %v773_v23 = vmax.f32 %v692_v17, %v768_v35 }
 0x204   :  { %v770_v29 = vpop.f32.mrf.mxu1 }
 0x206   :  { %v1249_v30 = vpop.f32.mrf.mxu1 }
 0x219   :  { %v848_v31 = vpop.f32.mrf.mxu0 }
 0x21a   :  { %v849_v20 = vadd.f32 %v994_v34, %v848_v31 }
 0x21b   :  { %v1268_v5 = vpop.f32.mrf.mxu0 }
 0x21c   :  { %v854_v26 = vmax.f32 %v773_v23, %v849_v20 }
 0x21d   :  { %v851_v32 = vpop.f32.mrf.mxu0 }
 0x21f   :  { %v1269_v11 = vpop.f32.mrf.mxu0 }
 0x228   :  { %v929_v37 = vpop.f32.mrf.mxu1 }
 0x229   :  { %v930_v38 = vadd.f32 %v997_v36, %v929_v37 }
 0x22a   :  { %v1288_v39 = vpop.f32.mrf.mxu1 }
 0x22b   :  { %v935_v41 = vmax.f32 %v854_v26, %v930_v38 }
 0x22c   :  { %v932_v42 = vpop.f32.mrf.mxu1 }
 0x22d   :  { %v943_v43 = vadd.f32 %v999_v40, %v935_v41 }
 0x22e   :  { %v1289_v44 = vpop.f32.mrf.mxu1 }
 0x22f   :  { %944 = vst [vmem:[#allocation8] sm:$0x3] %v943_v43 }
 0x230   :  { %1499 = shalt.err (!%p1496_p5)
}
 0x231   :  { %954 = dma.vmem_to_hbm [thread:$0]  %s952_s8, 32, %s1968_s4, [#allocation4]  }
 0x232   :  { %1512 = dma.done.wait [#allocation4], 32  }
 0x233   :  { %1513 = vsyncadd [#allocation4], 4294967264 }
 0x234   :  { %958 = vsyncpa [#allocation3], 1 }
 0x235   :  { %959 = vsyncpa [#allocation6], 1 }
 0x236   :  { %960 = vsyncpa [#allocation4], 1 }

</bundles_post_ra>
